<compile_context>
chip_gen: v7x
topology: tpu7x:2x2x1
jax: 0.10.0
libtpu: 0.0.40
codegen_flags: <defaults>
</compile_context>

<pallas_src>
import numpy as np
import jax
import jax.numpy as jnp
from jax.experimental import pallas as pl
from jax.experimental.pallas import tpu as pltpu

TAU = 2.0      # LIFNode default tau
V_TH = 1.0     # LIFNode default v_threshold
BN_EPS = 1e-5  # BatchNorm2d default eps


# ------------------------------ Pallas kernel ------------------------------

def _patchcell_kernel(pxT_ref, w123_ref, b123_ref, w12_ref, b12_ref,
                      w23_ref, b23_ref, shiftT_ref, out_ref):
    """Entire PatchCell forward on one (channels, M) tile held in VMEM.

    pxT    : (9*Cin, M)    transposed im2col of the input (stride-2 taps)
    w123   : (3*cn, 9*Cin) BN-scale-folded weights of the 3 init convs
    b123   : (3*cn, 1)     folded BN biases of the 3 init convs
    w12/23 : (9*cn, cn)    per-tap stacked, scale-folded spike-conv weights^T
    b12/23 : (cn, 1)       folded BN biases
    shiftT : (9, M, M)     shiftT[t][m', m] = 1 iff m' is the (zero-padded)
                           3x3 neighbour of output position m for tap t
    out    : (3*cn, M)     rows = [node1; node2; node3], lanes = M (lane-dense)
    """
    cn = b12_ref.shape[0]
    f32 = jnp.float32

    # --- three fused stride-2 convs + folded BN ----------------------------
    nodes = jnp.dot(w123_ref[...], pxT_ref[...], preferred_element_type=f32)
    nodes = nodes + b123_ref[...]
    n1 = nodes[0 * cn:1 * cn, :]
    n2 = nodes[1 * cn:2 * cn, :]
    n3 = nodes[2 * cn:3 * cn, :]

    def lif_conv(node, wstack_ref, bias_ref):
        # LIF single step from reset: v = x/tau ; spike = (v >= v_th).
        spikes = jnp.where(node * (1.0 / TAU) >= V_TH, 1.0, 0.0).astype(f32)
        # Per-tap channel mix: rows [t*cn:(t+1)*cn] = W_t^T(folded) @ spikes.
        mixed = jnp.dot(wstack_ref[...], spikes, preferred_element_type=f32)
        acc = jnp.zeros_like(node)
        for t in range(9):          # unrolled; shiftT applies the padded taps
            acc = acc + jnp.dot(mixed[t * cn:(t + 1) * cn, :], shiftT_ref[t],
                                preferred_element_type=f32)
        return acc + bias_ref[...]

    # node2 += conv(lif(node1)) ; node3 += node1 + conv(lif(node2))
    n2 = n2 + lif_conv(n1, w12_ref, b12_ref)
    n3 = n3 + n1 + lif_conv(n2, w23_ref, b23_ref)

    out_ref[0 * cn:1 * cn, :] = n1.astype(out_ref.dtype)
    out_ref[1 * cn:2 * cn, :] = n2.astype(out_ref.dtype)
    out_ref[2 * cn:3 * cn, :] = n3.astype(out_ref.dtype)


def _patchcell_call(pxT, w123, b123, w12, b12, w23, b23, shiftT):
    K, M = pxT.shape
    c3 = w123.shape[0]
    cn = c3 // 3

    def full(shape):
        # Whole array as a single block (satisfies the (8,128) rule via
        # full-extent dims); total working set is well under 2 MiB.
        return pl.BlockSpec(shape, lambda i, _n=len(shape): (0,) * _n)

    return pl.pallas_call(
        _patchcell_kernel,
        out_shape=jax.ShapeDtypeStruct((c3, M), jnp.float32),
        grid=(1,),
        in_specs=[
            full((K, M)),
            full((c3, K)),
            full((c3, 1)),
            full((9 * cn, cn)),
            full((cn, 1)),
            full((9 * cn, cn)),
            full((cn, 1)),
            full((9, M, M)),
        ],
        out_specs=full((c3, M)),
        compiler_params=pltpu.CompilerParams(
            dimension_semantics=("arbitrary",)),
    )(pxT, w123, b123, w12, b12, w23, b23, shiftT)


# ------------------------------- JAX glue -----------------------------------

def _im2col(x_padded, stride):
    """x_padded: (N, Hp, Wp, C) already zero-padded for a 3x3 window."""
    N, Hp, Wp, C = x_padded.shape
    Ho = (Hp - 3) // stride + 1
    Wo = (Wp - 3) // stride + 1
    cols = []
    for dy in range(3):
        for dx in range(3):
            sl = jax.lax.slice(
                x_padded,
                (0, dy, dx, 0),
                (N, dy + (Ho - 1) * stride + 1, dx + (Wo - 1) * stride + 1, C),
                (1, stride, stride, 1))
            cols.append(sl)                            # (N, Ho, Wo, C)
    patches = jnp.concatenate(cols, axis=-1)           # taps (dy, dx) outer
    return patches.reshape(N * Ho * Wo, 9 * C), Ho, Wo


def _fold_init_w(w, scale):
    """(3,3,Cin,Cout) -> (Cout, 9*Cin), BN scale folded, rows = out channels."""
    wf = w * scale.reshape(1, 1, 1, -1)
    return wf.reshape(-1, w.shape[-1]).T


def _fold_tap_w(w, scale):
    """(3,3,cn_in,cn_out) -> (9*cn_out, cn_in): per-tap W_t^T stacked, folded."""
    wf = w * scale.reshape(1, 1, 1, -1)
    return jnp.transpose(wf, (0, 1, 3, 2)).reshape(9 * w.shape[-1], w.shape[2])


def _build_shiftT(N, Ho, Wo):
    """shiftT[t][m', m] = 1 iff m' = flat(n, ho+dy-1, wo+dx-1) is a valid
    (zero-padded) neighbour of output position m = flat(n, ho, wo), tap (dy,dx).
    Trace-time constant (numpy); tap order matches the weight flattening."""
    M = N * Ho * Wo
    st = np.zeros((9, M, M), np.float32)
    taps = [(dy, dx) for dy in range(3) for dx in range(3)]
    for t, (dy, dx) in enumerate(taps):
        for n in range(N):
            for ho in range(Ho):
                hi = ho + dy - 1
                if not 0 <= hi < Ho:
                    continue
                for wo in range(Wo):
                    wi = wo + dx - 1
                    if not 0 <= wi < Wo:
                        continue
                    st[t, (n * Ho + hi) * Wo + wi, (n * Ho + ho) * Wo + wo] = 1.0
    return jnp.asarray(st)


def patchcell_forward(x_nchw, params):
    x = jnp.transpose(x_nchw, (0, 2, 3, 1)).astype(jnp.float32)   # NCHW -> NHWC
    N = x.shape[0]
    cn = params["w_c2n1"].shape[-1]

    xp = jnp.pad(x, ((0, 0), (1, 1), (1, 1), (0, 0)))
    patches, Ho, Wo = _im2col(xp, stride=2)           # (M, 9*Cin)
    pxT = patches.T                                   # (9*Cin, M): lanes = M

    # Fuse the three init convs along the output-channel (sublane) axis.
    w123 = jnp.concatenate([
        _fold_init_w(params["w_c2n1"], params["s_c2n1"]),
        _fold_init_w(params["w_c2n2"], params["s_c2n2"]),
        _fold_init_w(params["w_c2n3"], params["s_c2n3"])], axis=0)
    b123 = jnp.concatenate([params["b_c2n1"], params["b_c2n2"],
                            params["b_c2n3"]]).reshape(3 * cn, 1)
    w12 = _fold_tap_w(params["w_n12"], params["s_n12"])
    b12 = params["b_n12"].reshape(cn, 1)
    w23 = _fold_tap_w(params["w_n23"], params["s_n23"])
    b23 = params["b_n23"].reshape(cn, 1)
    shiftT = _build_shiftT(N, Ho, Wo)

    outT = _patchcell_call(pxT, w123, b123, w12, b12, w23, b23, shiftT)

    # (3*cn, M) -> NCHW (N, cn, 3*Ho, Wo) with nodes concatenated along height.
    out = outT.reshape(3, cn, N, Ho, Wo)
    out = jnp.transpose(out, (2, 1, 0, 3, 4)).reshape(N, cn, 3 * Ho, Wo)
    return out


# ------------------------ deterministic parameters --------------------------

def init_params(key, in_channels, out_channels):
    assert out_channels % 3 == 0
    cn = out_channels // 3
    keys = jax.random.split(key, 10)

    def conv_w(k, cin, cout):
        # Scaled so the LIF neurons actually fire and both spike-conv paths
        # are exercised by the numerical check.
        return 0.3 * jax.random.normal(k, (3, 3, cin, cout), jnp.float32)

    def bn(k, c):
        k1, k2, k3, k4 = jax.random.split(k, 4)
        gamma = 1.0 + 0.1 * jax.random.normal(k1, (c,), jnp.float32)
        beta = 0.1 * jax.random.normal(k2, (c,), jnp.float32)
        mean = 0.1 * jax.random.normal(k3, (c,), jnp.float32)
        var = 1.0 + 0.1 * jnp.abs(jax.random.normal(k4, (c,), jnp.float32))
        scale = gamma / jnp.sqrt(var + BN_EPS)
        bias = beta - mean * scale
        return scale, bias

    params = {}
    for i, name in enumerate(["c2n1", "c2n2", "c2n3"]):
        params[f"w_{name}"] = conv_w(keys[i], in_channels, cn)
        params[f"s_{name}"], params[f"b_{name}"] = bn(keys[3 + i], cn)
    params["w_n12"] = conv_w(keys[6], cn, cn)
    params["s_n12"], params["b_n12"] = bn(keys[7], cn)
    params["w_n23"] = conv_w(keys[8], cn, cn)
    params["s_n23"], params["b_n23"] = bn(keys[9], cn)
    return params


# ----------------------------- pure-JAX reference ---------------------------

def _ref_conv_bn(x, w, scale, bias, stride):
    y = jax.lax.conv_general_dilated(
        x, w, (stride, stride), [(1, 1), (1, 1)],
        dimension_numbers=("NHWC", "HWIO", "NHWC"))
    return y * scale.reshape(1, 1, 1, -1) + bias.reshape(1, 1, 1, -1)


def _ref_lif(x):
    return jnp.where(x / TAU >= V_TH, 1.0, 0.0)


def patchcell_ref(x_nchw, params):
    x = jnp.transpose(x_nchw, (0, 2, 3, 1)).astype(jnp.float32)
    n1 = _ref_conv_bn(x, params["w_c2n1"], params["s_c2n1"], params["b_c2n1"], 2)
    n2 = _ref_conv_bn(x, params["w_c2n2"], params["s_c2n2"], params["b_c2n2"], 2)
    n3 = _ref_conv_bn(x, params["w_c2n3"], params["s_c2n3"], params["b_c2n3"], 2)
    n2 = n2 + _ref_conv_bn(_ref_lif(n1), params["w_n12"],
                           params["s_n12"], params["b_n12"], 1)
    n3 = n3 + n1 + _ref_conv_bn(_ref_lif(n2), params["w_n23"],
                                params["s_n23"], params["b_n23"], 1)
    out = jnp.concatenate([n1, n2, n3], axis=1)       # concat along height
    return jnp.transpose(out, (0, 3, 1, 2))           # NCHW (N, cn, 3*Ho, Wo)


# --------------------------------- main --------------------------------------

if __name__ == "__main__":
    key = jax.random.PRNGKey(0)
    k_x, k_p = jax.random.split(key)

    in_channels, out_channels = 4, 24                 # node_channels = 8
    x = jax.random.normal(k_x, (2, in_channels, 16, 16), jnp.float32)  # NCHW

    params = init_params(k_p, in_channels, out_channels)

    out = jax.block_until_ready(patchcell_forward(x, params))
    ref = jax.block_until_ready(patchcell_ref(x, params))

    assert out.shape == (2, out_channels // 3, 3 * 8, 8), out.shape
    err = float(jnp.max(jnp.abs(out - ref)))
    assert err < 1e-3, f"max abs err {err}"
    print("KERNEL_OK")
</pallas_src>

<mosaic_0001>
module attributes {stable_mosaic.version = 11 : i64} {
  func.func @_patchcell_kernel(%arg0: i32, %arg1: memref<36x128xf32, #tpu.memory_space<vmem>>, %arg2: memref<24x36xf32, #tpu.memory_space<vmem>>, %arg3: memref<24x1xf32, #tpu.memory_space<vmem>>, %arg4: memref<72x8xf32, #tpu.memory_space<vmem>>, %arg5: memref<8x1xf32, #tpu.memory_space<vmem>>, %arg6: memref<72x8xf32, #tpu.memory_space<vmem>>, %arg7: memref<8x1xf32, #tpu.memory_space<vmem>>, %arg8: memref<9x128x128xf32, #tpu.memory_space<vmem>>, %arg9: memref<24x128xf32, #tpu.memory_space<vmem>>) attributes {dimension_semantics = [#tpu.dimension_semantics<arbitrary>], iteration_bounds = array<i64: 1>, scalar_prefetch = 0 : i64, scratch_operands = 0 : i64, tpu.core_type = #tpu.core_type<tc>, window_params = [{pipeline_mode = #tpu.pipeline_mode<synchronous>, transform_indices = @transform_0, window_bounds = array<i64: 36, 128>}, {pipeline_mode = #tpu.pipeline_mode<synchronous>, transform_indices = @transform_1, window_bounds = array<i64: 24, 36>}, {pipeline_mode = #tpu.pipeline_mode<synchronous>, transform_indices = @transform_2, window_bounds = array<i64: 24, 1>}, {pipeline_mode = #tpu.pipeline_mode<synchronous>, transform_indices = @transform_3, window_bounds = array<i64: 72, 8>}, {pipeline_mode = #tpu.pipeline_mode<synchronous>, transform_indices = @transform_4, window_bounds = array<i64: 8, 1>}, {pipeline_mode = #tpu.pipeline_mode<synchronous>, transform_indices = @transform_5, window_bounds = array<i64: 72, 8>}, {pipeline_mode = #tpu.pipeline_mode<synchronous>, transform_indices = @transform_6, window_bounds = array<i64: 8, 1>}, {pipeline_mode = #tpu.pipeline_mode<synchronous>, transform_indices = @transform_7, window_bounds = array<i64: 9, 128, 128>}, {pipeline_mode = #tpu.pipeline_mode<synchronous>, transform_indices = @transform_8, window_bounds = array<i64: 24, 128>}]} {
    %c0 = arith.constant 0 : index
    %c0_0 = arith.constant 0 : index
    %0 = vector.load %arg2[%c0, %c0_0] : memref<24x36xf32, #tpu.memory_space<vmem>>, vector<24x36xf32>
    %c0_1 = arith.constant 0 : index
    %c0_2 = arith.constant 0 : index
    %1 = vector.load %arg1[%c0_1, %c0_2] : memref<36x128xf32, #tpu.memory_space<vmem>>, vector<36x128xf32>
    %cst = arith.constant dense<0.000000e+00> : vector<24x128xf32>
    %2 = tpu.matmul %0, %1, %cst {dimension_numbers = #tpu.dot_dimension_numbers<[1], [0], [0], [1], [0, 0, 1, 1], [], []>} : vector<24x36xf32>, vector<36x128xf32>, vector<24x128xf32> -> vector<24x128xf32>
    %c0_3 = arith.constant 0 : index
    %c0_4 = arith.constant 0 : index
    %3 = vector.load %arg3[%c0_3, %c0_4] : memref<24x1xf32, #tpu.memory_space<vmem>>, vector<24x1xf32>
    %4 = vector.broadcast %3 : vector<24x1xf32> to vector<24x128xf32>
    %5 = arith.addf %2, %4 : vector<24x128xf32>
    %6 = vector.extract_strided_slice %5 {offsets = [0, 0], sizes = [8, 128], strides = [1, 1]} : vector<24x128xf32> to vector<8x128xf32>
    %7 = vector.extract_strided_slice %5 {offsets = [8, 0], sizes = [8, 128], strides = [1, 1]} : vector<24x128xf32> to vector<8x128xf32>
    %8 = vector.extract_strided_slice %5 {offsets = [16, 0], sizes = [8, 128], strides = [1, 1]} : vector<24x128xf32> to vector<8x128xf32>
    %cst_5 = arith.constant 5.000000e-01 : f32
    %9 = vector.broadcast %cst_5 : f32 to vector<8x128xf32>
    %10 = arith.mulf %6, %9 : vector<8x128xf32>
    %cst_6 = arith.constant 1.000000e+00 : f32
    %11 = vector.broadcast %cst_6 : f32 to vector<8x128xf32>
    %12 = arith.cmpf oge, %10, %11 : vector<8x128xf32>
    %cst_7 = arith.constant 1.000000e+00 : f32
    %cst_8 = arith.constant 0.000000e+00 : f32
    %13 = vector.broadcast %cst_7 : f32 to vector<8x128xf32>
    %14 = vector.broadcast %cst_8 : f32 to vector<8x128xf32>
    %15 = arith.select %12, %13, %14 : vector<8x128xi1>, vector<8x128xf32>
    %c0_9 = arith.constant 0 : index
    %c0_10 = arith.constant 0 : index
    %16 = vector.load %arg4[%c0_9, %c0_10] : memref<72x8xf32, #tpu.memory_space<vmem>>, vector<72x8xf32>
    %cst_11 = arith.constant dense<0.000000e+00> : vector<72x128xf32>
    %17 = tpu.matmul %16, %15, %cst_11 {dimension_numbers = #tpu.dot_dimension_numbers<[1], [0], [0], [1], [0, 0, 1, 1], [], []>} : vector<72x8xf32>, vector<8x128xf32>, vector<72x128xf32> -> vector<72x128xf32>
    %cst_12 = arith.constant 0.000000e+00 : f32
    %18 = vector.broadcast %cst_12 : f32 to vector<8x128xf32>
    %19 = vector.extract_strided_slice %17 {offsets = [0, 0], sizes = [8, 128], strides = [1, 1]} : vector<72x128xf32> to vector<8x128xf32>
    %c0_13 = arith.constant 0 : index
    %c0_14 = arith.constant 0 : index
    %c0_15 = arith.constant 0 : index
    %20 = vector.load %arg8[%c0_13, %c0_14, %c0_15] : memref<9x128x128xf32, #tpu.memory_space<vmem>>, vector<1x128x128xf32>
    %21 = vector.shape_cast %20 : vector<1x128x128xf32> to vector<128x128xf32>
    %cst_16 = arith.constant dense<0.000000e+00> : vector<8x128xf32>
    %22 = tpu.matmul %19, %21, %cst_16 {dimension_numbers = #tpu.dot_dimension_numbers<[1], [0], [0], [1], [0, 0, 1, 1], [], []>} : vector<8x128xf32>, vector<128x128xf32>, vector<8x128xf32> -> vector<8x128xf32>
    %23 = arith.addf %18, %22 : vector<8x128xf32>
    %24 = vector.extract_strided_slice %17 {offsets = [8, 0], sizes = [8, 128], strides = [1, 1]} : vector<72x128xf32> to vector<8x128xf32>
    %c1 = arith.constant 1 : index
    %c0_17 = arith.constant 0 : index
    %c0_18 = arith.constant 0 : index
    %25 = vector.load %arg8[%c1, %c0_17, %c0_18] : memref<9x128x128xf32, #tpu.memory_space<vmem>>, vector<1x128x128xf32>
    %26 = vector.shape_cast %25 : vector<1x128x128xf32> to vector<128x128xf32>
    %cst_19 = arith.constant dense<0.000000e+00> : vector<8x128xf32>
    %27 = tpu.matmul %24, %26, %cst_19 {dimension_numbers = #tpu.dot_dimension_numbers<[1], [0], [0], [1], [0, 0, 1, 1], [], []>} : vector<8x128xf32>, vector<128x128xf32>, vector<8x128xf32> -> vector<8x128xf32>
    %28 = arith.addf %23, %27 : vector<8x128xf32>
    %29 = vector.extract_strided_slice %17 {offsets = [16, 0], sizes = [8, 128], strides = [1, 1]} : vector<72x128xf32> to vector<8x128xf32>
    %c2 = arith.constant 2 : index
    %c0_20 = arith.constant 0 : index
    %c0_21 = arith.constant 0 : index
    %30 = vector.load %arg8[%c2, %c0_20, %c0_21] : memref<9x128x128xf32, #tpu.memory_space<vmem>>, vector<1x128x128xf32>
    %31 = vector.shape_cast %30 : vector<1x128x128xf32> to vector<128x128xf32>
    %cst_22 = arith.constant dense<0.000000e+00> : vector<8x128xf32>
    %32 = tpu.matmul %29, %31, %cst_22 {dimension_numbers = #tpu.dot_dimension_numbers<[1], [0], [0], [1], [0, 0, 1, 1], [], []>} : vector<8x128xf32>, vector<128x128xf32>, vector<8x128xf32> -> vector<8x128xf32>
    %33 = arith.addf %28, %32 : vector<8x128xf32>
    %34 = vector.extract_strided_slice %17 {offsets = [24, 0], sizes = [8, 128], strides = [1, 1]} : vector<72x128xf32> to vector<8x128xf32>
    %c3 = arith.constant 3 : index
    %c0_23 = arith.constant 0 : index
    %c0_24 = arith.constant 0 : index
    %35 = vector.load %arg8[%c3, %c0_23, %c0_24] : memref<9x128x128xf32, #tpu.memory_space<vmem>>, vector<1x128x128xf32>
    %36 = vector.shape_cast %35 : vector<1x128x128xf32> to vector<128x128xf32>
    %cst_25 = arith.constant dense<0.000000e+00> : vector<8x128xf32>
    %37 = tpu.matmul %34, %36, %cst_25 {dimension_numbers = #tpu.dot_dimension_numbers<[1], [0], [0], [1], [0, 0, 1, 1], [], []>} : vector<8x128xf32>, vector<128x128xf32>, vector<8x128xf32> -> vector<8x128xf32>
    %38 = arith.addf %33, %37 : vector<8x128xf32>
    %39 = vector.extract_strided_slice %17 {offsets = [32, 0], sizes = [8, 128], strides = [1, 1]} : vector<72x128xf32> to vector<8x128xf32>
    %c4 = arith.constant 4 : index
    %c0_26 = arith.constant 0 : index
    %c0_27 = arith.constant 0 : index
    %40 = vector.load %arg8[%c4, %c0_26, %c0_27] : memref<9x128x128xf32, #tpu.memory_space<vmem>>, vector<1x128x128xf32>
    %41 = vector.shape_cast %40 : vector<1x128x128xf32> to vector<128x128xf32>
    %cst_28 = arith.constant dense<0.000000e+00> : vector<8x128xf32>
    %42 = tpu.matmul %39, %41, %cst_28 {dimension_numbers = #tpu.dot_dimension_numbers<[1], [0], [0], [1], [0, 0, 1, 1], [], []>} : vector<8x128xf32>, vector<128x128xf32>, vector<8x128xf32> -> vector<8x128xf32>
    %43 = arith.addf %38, %42 : vector<8x128xf32>
    %44 = vector.extract_strided_slice %17 {offsets = [40, 0], sizes = [8, 128], strides = [1, 1]} : vector<72x128xf32> to vector<8x128xf32>
    %c5 = arith.constant 5 : index
    %c0_29 = arith.constant 0 : index
    %c0_30 = arith.constant 0 : index
    %45 = vector.load %arg8[%c5, %c0_29, %c0_30] : memref<9x128x128xf32, #tpu.memory_space<vmem>>, vector<1x128x128xf32>
    %46 = vector.shape_cast %45 : vector<1x128x128xf32> to vector<128x128xf32>
    %cst_31 = arith.constant dense<0.000000e+00> : vector<8x128xf32>
    %47 = tpu.matmul %44, %46, %cst_31 {dimension_numbers = #tpu.dot_dimension_numbers<[1], [0], [0], [1], [0, 0, 1, 1], [], []>} : vector<8x128xf32>, vector<128x128xf32>, vector<8x128xf32> -> vector<8x128xf32>
    %48 = arith.addf %43, %47 : vector<8x128xf32>
    %49 = vector.extract_strided_slice %17 {offsets = [48, 0], sizes = [8, 128], strides = [1, 1]} : vector<72x128xf32> to vector<8x128xf32>
    %c6 = arith.constant 6 : index
    %c0_32 = arith.constant 0 : index
    %c0_33 = arith.constant 0 : index
    %50 = vector.load %arg8[%c6, %c0_32, %c0_33] : memref<9x128x128xf32, #tpu.memory_space<vmem>>, vector<1x128x128xf32>
    %51 = vector.shape_cast %50 : vector<1x128x128xf32> to vector<128x128xf32>
    %cst_34 = arith.constant dense<0.000000e+00> : vector<8x128xf32>
    %52 = tpu.matmul %49, %51, %cst_34 {dimension_numbers = #tpu.dot_dimension_numbers<[1], [0], [0], [1], [0, 0, 1, 1], [], []>} : vector<8x128xf32>, vector<128x128xf32>, vector<8x128xf32> -> vector<8x128xf32>
    %53 = arith.addf %48, %52 : vector<8x128xf32>
    %54 = vector.extract_strided_slice %17 {offsets = [56, 0], sizes = [8, 128], strides = [1, 1]} : vector<72x128xf32> to vector<8x128xf32>
    %c7 = arith.constant 7 : index
    %c0_35 = arith.constant 0 : index
    %c0_36 = arith.constant 0 : index
    %55 = vector.load %arg8[%c7, %c0_35, %c0_36] : memref<9x128x128xf32, #tpu.memory_space<vmem>>, vector<1x128x128xf32>
    %56 = vector.shape_cast %55 : vector<1x128x128xf32> to vector<128x128xf32>
    %cst_37 = arith.constant dense<0.000000e+00> : vector<8x128xf32>
    %57 = tpu.matmul %54, %56, %cst_37 {dimension_numbers = #tpu.dot_dimension_numbers<[1], [0], [0], [1], [0, 0, 1, 1], [], []>} : vector<8x128xf32>, vector<128x128xf32>, vector<8x128xf32> -> vector<8x128xf32>
    %58 = arith.addf %53, %57 : vector<8x128xf32>
    %59 = vector.extract_strided_slice %17 {offsets = [64, 0], sizes = [8, 128], strides = [1, 1]} : vector<72x128xf32> to vector<8x128xf32>
    %c8 = arith.constant 8 : index
    %c0_38 = arith.constant 0 : index
    %c0_39 = arith.constant 0 : index
    %60 = vector.load %arg8[%c8, %c0_38, %c0_39] : memref<9x128x128xf32, #tpu.memory_space<vmem>>, vector<1x128x128xf32>
    %61 = vector.shape_cast %60 : vector<1x128x128xf32> to vector<128x128xf32>
    %cst_40 = arith.constant dense<0.000000e+00> : vector<8x128xf32>
    %62 = tpu.matmul %59, %61, %cst_40 {dimension_numbers = #tpu.dot_dimension_numbers<[1], [0], [0], [1], [0, 0, 1, 1], [], []>} : vector<8x128xf32>, vector<128x128xf32>, vector<8x128xf32> -> vector<8x128xf32>
    %63 = arith.addf %58, %62 : vector<8x128xf32>
    %c0_41 = arith.constant 0 : index
    %c0_42 = arith.constant 0 : index
    %64 = vector.load %arg5[%c0_41, %c0_42] : memref<8x1xf32, #tpu.memory_space<vmem>>, vector<8x1xf32>
    %65 = vector.broadcast %64 : vector<8x1xf32> to vector<8x128xf32>
    %66 = arith.addf %63, %65 : vector<8x128xf32>
    %67 = arith.addf %7, %66 : vector<8x128xf32>
    %68 = arith.addf %8, %6 : vector<8x128xf32>
    %cst_43 = arith.constant 5.000000e-01 : f32
    %69 = vector.broadcast %cst_43 : f32 to vector<8x128xf32>
    %70 = arith.mulf %67, %69 : vector<8x128xf32>
    %cst_44 = arith.constant 1.000000e+00 : f32
    %71 = vector.broadcast %cst_44 : f32 to vector<8x128xf32>
    %72 = arith.cmpf oge, %70, %71 : vector<8x128xf32>
    %cst_45 = arith.constant 1.000000e+00 : f32
    %cst_46 = arith.constant 0.000000e+00 : f32
    %73 = vector.broadcast %cst_45 : f32 to vector<8x128xf32>
    %74 = vector.broadcast %cst_46 : f32 to vector<8x128xf32>
    %75 = arith.select %72, %73, %74 : vector<8x128xi1>, vector<8x128xf32>
    %c0_47 = arith.constant 0 : index
    %c0_48 = arith.constant 0 : index
    %76 = vector.load %arg6[%c0_47, %c0_48] : memref<72x8xf32, #tpu.memory_space<vmem>>, vector<72x8xf32>
    %cst_49 = arith.constant dense<0.000000e+00> : vector<72x128xf32>
    %77 = tpu.matmul %76, %75, %cst_49 {dimension_numbers = #tpu.dot_dimension_numbers<[1], [0], [0], [1], [0, 0, 1, 1], [], []>} : vector<72x8xf32>, vector<8x128xf32>, vector<72x128xf32> -> vector<72x128xf32>
    %cst_50 = arith.constant 0.000000e+00 : f32
    %78 = vector.broadcast %cst_50 : f32 to vector<8x128xf32>
    %79 = vector.extract_strided_slice %77 {offsets = [0, 0], sizes = [8, 128], strides = [1, 1]} : vector<72x128xf32> to vector<8x128xf32>
    %c0_51 = arith.constant 0 : index
    %c0_52 = arith.constant 0 : index
    %c0_53 = arith.constant 0 : index
    %80 = vector.load %arg8[%c0_51, %c0_52, %c0_53] : memref<9x128x128xf32, #tpu.memory_space<vmem>>, vector<1x128x128xf32>
    %81 = vector.shape_cast %80 : vector<1x128x128xf32> to vector<128x128xf32>
    %cst_54 = arith.constant dense<0.000000e+00> : vector<8x128xf32>
    %82 = tpu.matmul %79, %81, %cst_54 {dimension_numbers = #tpu.dot_dimension_numbers<[1], [0], [0], [1], [0, 0, 1, 1], [], []>} : vector<8x128xf32>, vector<128x128xf32>, vector<8x128xf32> -> vector<8x128xf32>
    %83 = arith.addf %78, %82 : vector<8x128xf32>
    %84 = vector.extract_strided_slice %77 {offsets = [8, 0], sizes = [8, 128], strides = [1, 1]} : vector<72x128xf32> to vector<8x128xf32>
    %c1_55 = arith.constant 1 : index
    %c0_56 = arith.constant 0 : index
    %c0_57 = arith.constant 0 : index
    %85 = vector.load %arg8[%c1_55, %c0_56, %c0_57] : memref<9x128x128xf32, #tpu.memory_space<vmem>>, vector<1x128x128xf32>
    %86 = vector.shape_cast %85 : vector<1x128x128xf32> to vector<128x128xf32>
    %cst_58 = arith.constant dense<0.000000e+00> : vector<8x128xf32>
    %87 = tpu.matmul %84, %86, %cst_58 {dimension_numbers = #tpu.dot_dimension_numbers<[1], [0], [0], [1], [0, 0, 1, 1], [], []>} : vector<8x128xf32>, vector<128x128xf32>, vector<8x128xf32> -> vector<8x128xf32>
    %88 = arith.addf %83, %87 : vector<8x128xf32>
    %89 = vector.extract_strided_slice %77 {offsets = [16, 0], sizes = [8, 128], strides = [1, 1]} : vector<72x128xf32> to vector<8x128xf32>
    %c2_59 = arith.constant 2 : index
    %c0_60 = arith.constant 0 : index
    %c0_61 = arith.constant 0 : index
    %90 = vector.load %arg8[%c2_59, %c0_60, %c0_61] : memref<9x128x128xf32, #tpu.memory_space<vmem>>, vector<1x128x128xf32>
    %91 = vector.shape_cast %90 : vector<1x128x128xf32> to vector<128x128xf32>
    %cst_62 = arith.constant dense<0.000000e+00> : vector<8x128xf32>
    %92 = tpu.matmul %89, %91, %cst_62 {dimension_numbers = #tpu.dot_dimension_numbers<[1], [0], [0], [1], [0, 0, 1, 1], [], []>} : vector<8x128xf32>, vector<128x128xf32>, vector<8x128xf32> -> vector<8x128xf32>
    %93 = arith.addf %88, %92 : vector<8x128xf32>
    %94 = vector.extract_strided_slice %77 {offsets = [24, 0], sizes = [8, 128], strides = [1, 1]} : vector<72x128xf32> to vector<8x128xf32>
    %c3_63 = arith.constant 3 : index
    %c0_64 = arith.constant 0 : index
    %c0_65 = arith.constant 0 : index
    %95 = vector.load %arg8[%c3_63, %c0_64, %c0_65] : memref<9x128x128xf32, #tpu.memory_space<vmem>>, vector<1x128x128xf32>
    %96 = vector.shape_cast %95 : vector<1x128x128xf32> to vector<128x128xf32>
    %cst_66 = arith.constant dense<0.000000e+00> : vector<8x128xf32>
    %97 = tpu.matmul %94, %96, %cst_66 {dimension_numbers = #tpu.dot_dimension_numbers<[1], [0], [0], [1], [0, 0, 1, 1], [], []>} : vector<8x128xf32>, vector<128x128xf32>, vector<8x128xf32> -> vector<8x128xf32>
    %98 = arith.addf %93, %97 : vector<8x128xf32>
    %99 = vector.extract_strided_slice %77 {offsets = [32, 0], sizes = [8, 128], strides = [1, 1]} : vector<72x128xf32> to vector<8x128xf32>
    %c4_67 = arith.constant 4 : index
    %c0_68 = arith.constant 0 : index
    %c0_69 = arith.constant 0 : index
    %100 = vector.load %arg8[%c4_67, %c0_68, %c0_69] : memref<9x128x128xf32, #tpu.memory_space<vmem>>, vector<1x128x128xf32>
    %101 = vector.shape_cast %100 : vector<1x128x128xf32> to vector<128x128xf32>
    %cst_70 = arith.constant dense<0.000000e+00> : vector<8x128xf32>
    %102 = tpu.matmul %99, %101, %cst_70 {dimension_numbers = #tpu.dot_dimension_numbers<[1], [0], [0], [1], [0, 0, 1, 1], [], []>} : vector<8x128xf32>, vector<128x128xf32>, vector<8x128xf32> -> vector<8x128xf32>
    %103 = arith.addf %98, %102 : vector<8x128xf32>
    %104 = vector.extract_strided_slice %77 {offsets = [40, 0], sizes = [8, 128], strides = [1, 1]} : vector<72x128xf32> to vector<8x128xf32>
    %c5_71 = arith.constant 5 : index
    %c0_72 = arith.constant 0 : index
    %c0_73 = arith.constant 0 : index
    %105 = vector.load %arg8[%c5_71, %c0_72, %c0_73] : memref<9x128x128xf32, #tpu.memory_space<vmem>>, vector<1x128x128xf32>
    %106 = vector.shape_cast %105 : vector<1x128x128xf32> to vector<128x128xf32>
    %cst_74 = arith.constant dense<0.000000e+00> : vector<8x128xf32>
    %107 = tpu.matmul %104, %106, %cst_74 {dimension_numbers = #tpu.dot_dimension_numbers<[1], [0], [0], [1], [0, 0, 1, 1], [], []>} : vector<8x128xf32>, vector<128x128xf32>, vector<8x128xf32> -> vector<8x128xf32>
    %108 = arith.addf %103, %107 : vector<8x128xf32>
    %109 = vector.extract_strided_slice %77 {offsets = [48, 0], sizes = [8, 128], strides = [1, 1]} : vector<72x128xf32> to vector<8x128xf32>
    %c6_75 = arith.constant 6 : index
    %c0_76 = arith.constant 0 : index
    %c0_77 = arith.constant 0 : index
    %110 = vector.load %arg8[%c6_75, %c0_76, %c0_77] : memref<9x128x128xf32, #tpu.memory_space<vmem>>, vector<1x128x128xf32>
    %111 = vector.shape_cast %110 : vector<1x128x128xf32> to vector<128x128xf32>
    %cst_78 = arith.constant dense<0.000000e+00> : vector<8x128xf32>
    %112 = tpu.matmul %109, %111, %cst_78 {dimension_numbers = #tpu.dot_dimension_numbers<[1], [0], [0], [1], [0, 0, 1, 1], [], []>} : vector<8x128xf32>, vector<128x128xf32>, vector<8x128xf32> -> vector<8x128xf32>
    %113 = arith.addf %108, %112 : vector<8x128xf32>
    %114 = vector.extract_strided_slice %77 {offsets = [56, 0], sizes = [8, 128], strides = [1, 1]} : vector<72x128xf32> to vector<8x128xf32>
    %c7_79 = arith.constant 7 : index
    %c0_80 = arith.constant 0 : index
    %c0_81 = arith.constant 0 : index
    %115 = vector.load %arg8[%c7_79, %c0_80, %c0_81] : memref<9x128x128xf32, #tpu.memory_space<vmem>>, vector<1x128x128xf32>
    %116 = vector.shape_cast %115 : vector<1x128x128xf32> to vector<128x128xf32>
    %cst_82 = arith.constant dense<0.000000e+00> : vector<8x128xf32>
    %117 = tpu.matmul %114, %116, %cst_82 {dimension_numbers = #tpu.dot_dimension_numbers<[1], [0], [0], [1], [0, 0, 1, 1], [], []>} : vector<8x128xf32>, vector<128x128xf32>, vector<8x128xf32> -> vector<8x128xf32>
    %118 = arith.addf %113, %117 : vector<8x128xf32>
    %119 = vector.extract_strided_slice %77 {offsets = [64, 0], sizes = [8, 128], strides = [1, 1]} : vector<72x128xf32> to vector<8x128xf32>
    %c8_83 = arith.constant 8 : index
    %c0_84 = arith.constant 0 : index
    %c0_85 = arith.constant 0 : index
    %120 = vector.load %arg8[%c8_83, %c0_84, %c0_85] : memref<9x128x128xf32, #tpu.memory_space<vmem>>, vector<1x128x128xf32>
    %121 = vector.shape_cast %120 : vector<1x128x128xf32> to vector<128x128xf32>
    %cst_86 = arith.constant dense<0.000000e+00> : vector<8x128xf32>
    %122 = tpu.matmul %119, %121, %cst_86 {dimension_numbers = #tpu.dot_dimension_numbers<[1], [0], [0], [1], [0, 0, 1, 1], [], []>} : vector<8x128xf32>, vector<128x128xf32>, vector<8x128xf32> -> vector<8x128xf32>
    %123 = arith.addf %118, %122 : vector<8x128xf32>
    %c0_87 = arith.constant 0 : index
    %c0_88 = arith.constant 0 : index
    %124 = vector.load %arg7[%c0_87, %c0_88] : memref<8x1xf32, #tpu.memory_space<vmem>>, vector<8x1xf32>
    %125 = vector.broadcast %124 : vector<8x1xf32> to vector<8x128xf32>
    %126 = arith.addf %123, %125 : vector<8x128xf32>
    %127 = arith.addf %68, %126 : vector<8x128xf32>
    %c0_89 = arith.constant 0 : index
    %c0_90 = arith.constant 0 : index
    %128 = vector.load %arg9[%c0_89, %c0_90] : memref<24x128xf32, #tpu.memory_space<vmem>>, vector<8x128xf32>
    tpu.vector_store %arg9[%c0_89, %c0_90], %6 {strides = array<i32>} : memref<24x128xf32, #tpu.memory_space<vmem>>, vector<8x128xf32>,
    %c8_91 = arith.constant 8 : index
    %c0_92 = arith.constant 0 : index
    %129 = vector.load %arg9[%c8_91, %c0_92] : memref<24x128xf32, #tpu.memory_space<vmem>>, vector<8x128xf32>
    tpu.vector_store %arg9[%c8_91, %c0_92], %67 {strides = array<i32>} : memref<24x128xf32, #tpu.memory_space<vmem>>, vector<8x128xf32>,
    %c16 = arith.constant 16 : index
    %c0_93 = arith.constant 0 : index
    %130 = vector.load %arg9[%c16, %c0_93] : memref<24x128xf32, #tpu.memory_space<vmem>>, vector<8x128xf32>
    tpu.vector_store %arg9[%c16, %c0_93], %127 {strides = array<i32>} : memref<24x128xf32, #tpu.memory_space<vmem>>, vector<8x128xf32>,
    return
  }
  func.func @transform_0(%arg0: i32) -> (i32, i32) {
    %c0_i32 = arith.constant 0 : i32
    %c0_i32_0 = arith.constant 0 : i32
    %c0_i32_1 = arith.constant 0 : i32
    return %c0_i32, %c0_i32_0 : i32, i32
  }
  func.func @transform_1(%arg0: i32) -> (i32, i32) {
    %c0_i32 = arith.constant 0 : i32
    %c0_i32_0 = arith.constant 0 : i32
    %c0_i32_1 = arith.constant 0 : i32
    return %c0_i32, %c0_i32_0 : i32, i32
  }
  func.func @transform_2(%arg0: i32) -> (i32, i32) {
    %c0_i32 = arith.constant 0 : i32
    %c0_i32_0 = arith.constant 0 : i32
    %c0_i32_1 = arith.constant 0 : i32
    return %c0_i32, %c0_i32_0 : i32, i32
  }
  func.func @transform_3(%arg0: i32) -> (i32, i32) {
    %c0_i32 = arith.constant 0 : i32
    %c0_i32_0 = arith.constant 0 : i32
    %c0_i32_1 = arith.constant 0 : i32
    return %c0_i32, %c0_i32_0 : i32, i32
  }
  func.func @transform_4(%arg0: i32) -> (i32, i32) {
    %c0_i32 = arith.constant 0 : i32
    %c0_i32_0 = arith.constant 0 : i32
    %c0_i32_1 = arith.constant 0 : i32
    return %c0_i32, %c0_i32_0 : i32, i32
  }
  func.func @transform_5(%arg0: i32) -> (i32, i32) {
    %c0_i32 = arith.constant 0 : i32
    %c0_i32_0 = arith.constant 0 : i32
    %c0_i32_1 = arith.constant 0 : i32
    return %c0_i32, %c0_i32_0 : i32, i32
  }
  func.func @transform_6(%arg0: i32) -> (i32, i32) {
    %c0_i32 = arith.constant 0 : i32
    %c0_i32_0 = arith.constant 0 : i32
    %c0_i32_1 = arith.constant 0 : i32
    return %c0_i32, %c0_i32_0 : i32, i32
  }
  func.func @transform_7(%arg0: i32) -> (i32, i32, i32) {
    %c0_i32 = arith.constant 0 : i32
    %c0_i32_0 = arith.constant 0 : i32
    %c0_i32_1 = arith.constant 0 : i32
    %c0_i32_2 = arith.constant 0 : i32
    return %c0_i32, %c0_i32_0, %c0_i32_1 : i32, i32, i32
  }
  func.func @transform_8(%arg0: i32) -> (i32, i32) {
    %c0_i32 = arith.constant 0 : i32
    %c0_i32_0 = arith.constant 0 : i32
    %c0_i32_1 = arith.constant 0 : i32
    return %c0_i32, %c0_i32_0 : i32, i32
  }
}

</mosaic_0001>

<bundles_post_ra>
// kernel: tpu_custom_call.1
= control target key start
LH: loop header
LB: loop body
LE: loop exit
PB: predicated region body
PF: predicated region fallthrough
CT: control target
= control target key end

     0   :  { %13 = vsyncpa [#allocation3], 0  ;;  %s4276_s0 = inlined_call_operand.vmem [shape: f32[36,128], index: 0, kind: input, shape index: {}]   ;;  %s4277_s1 = inlined_call_operand.vmem [shape: f32[24,36], index: 1, kind: input, shape index: {}]   ;;  %s4278_s2 = inlined_call_operand.vmem [shape: f32[24,1], index: 2, kind: input, shape index: {}]   ;;  %s4279_s3 = inlined_call_operand.vmem [shape: f32[72,8], index: 3, kind: input, shape index: {}]   ;;  %s4280_s4 = inlined_call_operand.vmem [shape: f32[8,1], index: 4, kind: input, shape index: {}]   ;;  %s4281_s5 = inlined_call_operand.vmem [shape: f32[72,8], index: 5, kind: input, shape index: {}]   ;;  %s4282_s6 = inlined_call_operand.vmem [shape: f32[8,1], index: 6, kind: input, shape index: {}]   ;;  %s4283_s7 = inlined_call_operand.hbm [shape: f32[9,128,128], index: 7, kind: input, shape index: {}]   ;;  %s4284_s8 = inlined_call_operand.hbm [shape: f32[24,128], index: 8, kind: output, shape index: {}]  }
   0x1   :  { %14 = vsyncpa [#allocation4], 0  ;;  %s3525_s27 = smov [#allocation2]   ;;  %s3477_s9 = scalar_lea.hbm %s4283_s7, 18432 }
   0x2   :  { %s34_s28 = sshll.u32 %s3525_s27, 4  ;;  %p3478_p0 = scmp.ne.s32.totalorder %s4283_s7, %s3477_s9  ;;  %s35_s28 = int_to_ptr.vmem [resolvable:$true] %s34_s28 }
   0x3   :  { %p3481_p1 = scmp.lt.u32.totalorder %s3477_s9, %s4283_s7 }
   0x5   :  { %p3483_p2 = pnand %p3481_p1, %p3478_p0 }
   0x7   :  { %3486 = shalt.err (!%p3483_p2)
}
   0x8   :  { %s3487_s14 = scalar_lea.vmem %s35_s28, 18432  ;;  %p3492_p4 = scmp.lt.s32.totalorder %s35_s28, %s35_s28 }
   0x9   :  { %p3488_p3 = scmp.ne.s32.totalorder %s35_s28, %s3487_s14  ;;  %p3493_p5 = scmp.lt.s32.totalorder %s3487_s14, %s3487_s14 }
   0xb   :  { %p3494_p6 = por %p3493_p5, %p3492_p4 }
   0xd   :  { %p3495_p7 = pnand %p3494_p6, %p3488_p3 }
   0xf   :  { %3498 = shalt.err (!%p3495_p7)
}
  0x10   :  { %s3526_s15 = smov 128   ;;  %s3527_s16 = smov 8  }
  0x11   :  { %40 = dma.hbm_to_vmem [thread:$0]  %s4283_s7, 18432, %s35_s28, [#allocation3], %s3526_s15, %s3526_s15, %s3527_s16  }
  0x12   :  { %3521 = dma.done.wait [#allocation3], 18432  }
  0x13   :  { %3522 = vsyncadd [#allocation3], 4294948864  ;;  %v4301_v0 = vmov 0.0|0.0   ;;  %vm3529_vm0 = vmmov 0   ;;  %v4287_v1 = vmov 0.0   ;;  %v3531_v2 = vmov 0  }
  0x14   :  { %2991 = vmatprep.subr.bf16.mxu0 %v4301_v0  ;;  %2294 = vmatprep.mubr.msk.f32.mxu0 %vm3529_vm0, %v4287_v1  ;;  %v47_v3 = vld [vmem:[%s4276_s0] sm:$0xff]  ;;  %v48_v4 = vld [vmem:[%s4276_s0 + $0x8] sm:$0xff]  ;;  %v49_v5 = vld [vmem:[%s4276_s0 + $0x10] sm:$0xff]  ;;  %vm80_vm1 = vcmask 1043456   ;;  %vm70_vm2 = vcmask 293888   ;;  %vm176_vm3 = vcmask 64512  }
  0x15   :  { %3475 = vset.pattern.permute.xlu0 %v3531_v2  ;;  %3476 = vset.pattern.permute.xlu1 %v3531_v2  ;;  %v2992_v6 = vpack.c.bf16 %v48_v4, %v47_v3  ;;  %v50_v7 = vld [vmem:[%s4276_s0 + $0x18] sm:$0xff]  ;;  %v52_v8 = vld [vmem:[%s4278_s2] sm:$0xff]  ;;  %v53_v11 = vld [vmem:[%s4278_s2 + $0x8] sm:$0xff]  ;;  %v4285_v33 = vmov 1.0  }
  0x16   :  { %2303 = vmatprep.subr.mxu1 %v4287_v1  ;;  %2305 = vmatprep.mubr.msk.f32.mxu1 %vm3529_vm0, %v4287_v1  ;;  %v2995_v9 = vpack.c.bf16 %v50_v7, %v49_v5  ;;  %v1103_v10 = vld [vmem:[%s4280_s4] sm:$0xff]  ;;  %v54_v12 = vld [vmem:[%s4278_s2 + $0x10] sm:$0xff]  ;;  %v45_v16 = vld [vmem:[%s4277_s1 + $0x8] sm:$0xff] }
  0x17   :  { %2993 = vmatpush3.bf16.msra.mxu0 %v2992_v6  ;;  %57 = vperm.xlu0 %3475, %v52_v8   ;;  %v51_v13 = vld [vmem:[%s4276_s0 + $0x20] sm:$0xf]  ;;  %v46_v17 = vld [vmem:[%s4277_s1 + $0x10] sm:$0xff]  ;;  %v332_v24 = vld [vmem:[#allocation2 + $0x88] sm:$0xff] }
  0x18   :  { %2994 = vmatprep.subr.bf16.mxu0 %v4301_v0  ;;  %1106 = vperm.xlu1 %3476, %v1103_v10   ;;  %v1898_v14 = vld [vmem:[%s4282_s6] sm:$0xff]  ;;  %v333_v31 = vld [vmem:[#allocation2 + $0x90] sm:$0xff]  ;;  %v334_v32 = vld [vmem:[#allocation2 + $0x98] sm:$0xff] }
  0x19   :  { %v44_v15 = vld [vmem:[%s4277_s1] sm:$0xff]  ;;  %v168_v36 = vld [vmem:[%s4279_s3 + $0x8] sm:$0xff]  ;;  %v3666_v37 = vpack.c.bf16 %v334_v32, %v333_v31  ;;  %v169_v42 = vld [vmem:[%s4279_s3 + $0x10] sm:$0xff] }
  0x1a   :  { %v331_v23 = vld [vmem:[#allocation2 + $0x80] sm:$0xff]  ;;  %v336_v40 = vld [vmem:[#allocation2 + $0xa8] sm:$0xff]  ;;  %v337_v44 = vld [vmem:[#allocation2 + $0xb0] sm:$0xff] }
  0x1b   :  { %2996 = vmatpush3.bf16.msra.mxu0 %v2995_v9  ;;  %62 = vperm.xlu0 %3475, %v53_v11   ;;  %v167_v28 = vld [vmem:[%s4279_s3] sm:$0xff]  ;;  %v3655_v29 = vpack.c.bf16 %v332_v24, %v331_v23  ;;  %v338_v45 = vld [vmem:[#allocation2 + $0xb8] sm:$0xff]  ;;  %v340_v49 = vld [vmem:[#allocation2 + $0xc8] sm:$0xff] }
  0x1c   :  { %2292 = vmatprep.subr.mxu0 %v4287_v1  ;;  %67 = vperm.xlu1 %3476, %v54_v12   ;;  %v335_v39 = vld [vmem:[#allocation2 + $0xa0] sm:$0xff]  ;;  %v170_v46 = vld [vmem:[%s4279_s3 + $0x18] sm:$0xff]  ;;  %v3688_v47 = vpack.c.bf16 %v338_v45, %v337_v44  ;;  %v341_v52 = vld [vmem:[#allocation2 + $0xd0] sm:$0xff] }
  0x1d   :  { %v3678_v43 = vpack.c.bf16 %v336_v40, %v335_v39  ;;  %v339_v48 = vld [vmem:[#allocation2 + $0xc0] sm:$0xff]  ;;  %v342_v53 = vld [vmem:[#allocation2 + $0xd8] sm:$0xff]  ;;  %v172_v54 = vld [vmem:[%s4279_s3 + $0x28] sm:$0xff] }
  0x1e   :  { %v171_v50 = vld [vmem:[%s4279_s3 + $0x20] sm:$0xff]  ;;  %v3698_v51 = vpack.c.bf16 %v340_v49, %v339_v48  ;;  %v3708_v55 = vpack.c.bf16 %v342_v53, %v341_v52  ;;  %v344_v57 = vld [vmem:[#allocation2 + $0xe8] sm:$0xff]  ;;  %v173_v58 = vld [vmem:[%s4279_s3 + $0x30] sm:$0xff] }
  0x1f   :  { %2293 = vmatpush3.msk.msra.mxu0 %vm80_vm1, %v51_v13  ;;  %1901 = vperm.xlu0 %3475, %v1898_v14   ;;  %v343_v56 = vld [vmem:[#allocation2 + $0xe0] sm:$0xff]  ;;  %v174_v60 = vld [vmem:[%s4279_s3 + $0x38] sm:$0xff]  ;;  %v345_v61 = vld [vmem:[#allocation2 + $0xf0] sm:$0xff] }
  0x20   :  { %2295 = vmatmul.mubr.msk.f32.vlgmr.msra.gmra.mrb[0].mxu0 %vm70_vm2, %v44_v15  ;;  %3189 = vmatprep.subr.bf16.mxu0 %v4301_v0  ;;  %v3718_v59 = vpack.c.bf16 %v344_v57, %v343_v56  ;;  %v346_v62 = vld [vmem:[#allocation2 + $0xf8] sm:$0xff]  ;;  %v175_v63 = vld [vmem:[%s4279_s3 + $0x40] sm:$0xff]  ;;  %v315_v4 = vld [vmem:[#allocation2 + $0x8] sm:$0xff] }
  0x21   :  { %2297 = vmatprep.mubr.msk.f32.mxu0 %vm3529_vm0, %v4287_v1  ;;  %v3735_v2 = vpack.c.bf16 %v346_v62, %v345_v61  ;;  %v314_v3 = vld [vmem:[#allocation2] sm:$0xff]  ;;  %v316_v8 = vld [vmem:[#allocation2 + $0x10] sm:$0xff]  ;;  %v317_v9 = vld [vmem:[#allocation2 + $0x18] sm:$0xff] }
  0x22   :  { %v3742_v7 = vpack.c.bf16 %v315_v4, %v314_v3  ;;  %v3745_v12 = vpack.c.bf16 %v317_v9, %v316_v8  ;;  %v318_v13 = vld [vmem:[#allocation2 + $0x20] sm:$0xff]  ;;  %v319_v14 = vld [vmem:[#allocation2 + $0x28] sm:$0xff]  ;;  %v324_v31 = vld [vmem:[#allocation2 + $0x50] sm:$0xff] }
  0x23   :  { %v322_v24 = vld [vmem:[#allocation2 + $0x40] sm:$0xff]  ;;  %v325_v32 = vld [vmem:[#allocation2 + $0x58] sm:$0xff]  ;;  %v328_v40 = vld [vmem:[#allocation2 + $0x70] sm:$0xff] }
  0x24   :  { %2298 = vmatmul.mubr.msk.f32.gmra.mrb[2].mxu0 %vm70_vm2, %v45_v16  ;;  %v488_v44 = vld [vmem:[#allocation2 + $0x100] sm:$0xff]  ;;  %v489_v45 = vld [vmem:[#allocation2 + $0x108] sm:$0xff]  ;;  %v490_v49 = vld [vmem:[#allocation2 + $0x110] sm:$0xff] }
  0x25   :  { %2300 = vmatprep.mubr.msk.f32.mxu0 %vm3529_vm0, %v4287_v1  ;;  %v493_v56 = vld [vmem:[#allocation2 + $0x128] sm:$0xff]  ;;  %v496_v62 = vld [vmem:[#allocation2 + $0x140] sm:$0xff]  ;;  %v498_v4 = vld [vmem:[#allocation2 + $0x150] sm:$0xff] }
  0x26   :  { %v1017_v8 = vld [vmem:[#allocation2 + $0x408] sm:$0xff] }
  0x28   :  { %2301 = vmatmul.mubr.msk.f32.gmra.mrb[4].mxu0 %vm70_vm2, %v46_v17  ;;  %v3753_v17 = vpack.c.bf16 %v319_v14, %v318_v13  ;;  %v501_v13 = vld [vmem:[#allocation2 + $0x168] sm:$0xff]  ;;  %v1018_v14 = vld [vmem:[#allocation2 + $0x410] sm:$0xff] }
  0x29   :  { %2644 = vmatprep.mubr.msk.f32.mxu0 %vm3529_vm0, %v4287_v1 }
  0x96   :  { %v58_v19 = vpop.permute.xlu0 %57 }
  0x97   :  { %v3648_v18 = vpop.permute.xlu1 %1106 }
  0x9b   :  { %v68_v26 = vpop.permute.xlu1 %67 }
  0xf3   :  { %v150_v20 = vpop.f32.mrb[0].mxu0 }
  0xf4   :  { %v151_v21 = vadd.f32 %v150_v20, %v58_v19  ;;  %v2296_v22 = vpop.f32.mrb[1].mxu0  ;;  %v320_v19 = vld [vmem:[#allocation2 + $0x30] sm:$0xff]  ;;  %v321_v20 = vld [vmem:[#allocation2 + $0x38] sm:$0xff] }
  0xf5   :  { %v3759_v23 = vpack.c.bf16 %v321_v20, %v320_v19 }
  0xf6   :  { %1906 = vst [vmem:[#allocation5] sm:$0xff] %v151_v21  ;;  %v164_v25 = vmul.f32 0.5, %v151_v21  ;;  %v3433_v34 = vadd.f32 %v151_v21, %v68_v26 }
  0xf7   :  { %v3650_v27 = vpop.f32.mrb[2].mxu0 }
  0xf8   :  { %vm165_vm4 = vcmp.ge.f32.partialorder %v164_v25, 1.0  ;;  %v2299_v30 = vpop.f32.mrb[3].mxu0  ;;  %v323_v25 = vld [vmem:[#allocation2 + $0x48] sm:$0xff] }
  0xf9   :  { %2304 = vmatpush3.msk.msra.mxu1 %vm165_vm4, %v4285_v33  ;;  %v3765_v30 = vpack.c.bf16 %v323_v25, %v322_v24  ;;  %v503_v24 = vld [vmem:[#allocation2 + $0x178] sm:$0xff]  ;;  %v1020_v25 = vld [vmem:[#allocation2 + $0x420] sm:$0xff] }
  0xfa   :  { %2306 = vmatmul.mubr.msk.f32.vlgmr.msra.gmra.mrb[0].mxu1 %vm176_vm3, %v167_v28  ;;  %2997 = vmatprep.subr.bf16.mxu1 %v4301_v0 }
  0xfb   :  { %v160_v35 = vpop.f32.mrb[4].mxu0  ;;  %2308 = vmatprep.mubr.msk.f32.mxu1 %vm3529_vm0, %v4287_v1  ;;  %2999 = vmatpush3.bf16.msra.mxu1 %v3655_v29 }
  0xfc   :  { %v3668_v38 = vadd.f32 %v3433_v34, %v160_v35  ;;  %3000 = vmatprep.subr.bf16.mxu1 %v4301_v0  ;;  %v2302_v41 = vpop.f32.mrb[5].mxu0  ;;  %v3769_v34 = vpack.c.bf16 %v325_v32, %v324_v31  ;;  %v326_v35 = vld [vmem:[#allocation2 + $0x60] sm:$0xff] }
  0xfd   :  { %v329_v41 = vld [vmem:[#allocation2 + $0x78] sm:$0xff] }
  0xfe   :  { %4305 = vst [vmem:[#allocation8_spill] sm:$0xff] %v3668_v38  ;;  %2309 = vmatmul.mubr.msk.f32.gmra.mrb[2].mxu1 %vm176_vm3, %v168_v36  ;;  %v327_v36 = vld [vmem:[#allocation2 + $0x68] sm:$0xff] }
  0xff   :  { %2311 = vmatprep.mubr.msk.f32.mxu1 %vm3529_vm0, %v4287_v1  ;;  %3002 = vmatpush3.bf16.msra.mxu1 %v3666_v37  ;;  %v3773_v39 = vpack.c.bf16 %v327_v36, %v326_v35  ;;  %v576_v35 = vld [vmem:[#allocation2 + $0x180] sm:$0xff]  ;;  %v577_v36 = vld [vmem:[#allocation2 + $0x188] sm:$0xff] }
 0x100   :  { %3003 = vmatprep.subr.bf16.mxu1 %v4301_v0 }
 0x102   :  { %2312 = vmatmul.mubr.msk.f32.gmra.mrb[4].mxu1 %vm176_vm3, %v169_v42  ;;  %v3777_v42 = vpack.c.bf16 %v329_v41, %v328_v40  ;;  %v1022_v40 = vld [vmem:[#allocation2 + $0x430] sm:$0xff]  ;;  %v1023_v41 = vld [vmem:[#allocation2 + $0x438] sm:$0xff] }
 0x103   :  { %2314 = vmatprep.mubr.msk.f32.mxu1 %vm3529_vm0, %v4287_v1  ;;  %3005 = vmatpush3.bf16.msra.mxu1 %v3678_v43 }
 0x104   :  { %3006 = vmatprep.subr.bf16.mxu1 %v4301_v0 }
 0x106   :  { %2315 = vmatmul.mubr.msk.f32.gmra.mrb[6].mxu1 %vm176_vm3, %v170_v46  ;;  %v3781_v46 = vpack.c.bf16 %v489_v45, %v488_v44  ;;  %v3828_v44 = vpack.c.bf16 %v1023_v41, %v1022_v40  ;;  %v3831_v45 = vpack.c.bf16 %v577_v36, %v576_v35  ;;  %v585_v35 = vld [vmem:[#allocation2 + $0x1c8] sm:$0xff]  ;;  %v1030_v40 = vld [vmem:[#allocation2 + $0x470] sm:$0xff]  ;;  %v1031_v41 = vld [vmem:[#allocation2 + $0x478] sm:$0xff] }
 0x107   :  { %2317 = vmatprep.mubr.msk.f32.mxu1 %vm3529_vm0, %v4287_v1  ;;  %3008 = vmatpush3.bf16.msra.mxu1 %v3688_v47 }
 0x108   :  { %3009 = vmatprep.subr.bf16.mxu1 %v4301_v0  ;;  %4309 = vst [vmem:[#allocation12_spill] sm:$0xff] %v3828_v44 }
 0x10a   :  { %2318 = vmatmul.mubr.msk.f32.gmra.mrb[8].mxu1 %vm176_vm3, %v171_v50  ;;  %v491_v50 = vld [vmem:[#allocation2 + $0x118] sm:$0xff] }
 0x10b   :  { %2320 = vmatprep.mubr.msk.f32.mxu1 %vm3529_vm0, %v4287_v1  ;;  %3011 = vmatpush3.bf16.msra.mxu1 %v3698_v51  ;;  %v3787_v53 = vpack.c.bf16 %v491_v50, %v490_v49  ;;  %v578_v50 = vld [vmem:[#allocation2 + $0x190] sm:$0xff] }
 0x10c   :  { %3012 = vmatprep.subr.bf16.mxu1 %v4301_v0 }
 0x10e   :  { %2321 = vmatmul.mubr.msk.f32.gmra.mrb[10].mxu1 %vm176_vm3, %v172_v54  ;;  %v492_v54 = vld [vmem:[#allocation2 + $0x120] sm:$0xff] }
 0x10f   :  { %2323 = vmatprep.mubr.msk.f32.mxu1 %vm3529_vm0, %v4287_v1  ;;  %3014 = vmatpush3.bf16.msra.mxu1 %v3708_v55  ;;  %v3793_v57 = vpack.c.bf16 %v493_v56, %v492_v54  ;;  %v1024_v56 = vld [vmem:[#allocation2 + $0x440] sm:$0xff] }
 0x110   :  { %3015 = vmatprep.subr.bf16.mxu1 %v4301_v0 }
 0x112   :  { %2324 = vmatmul.mubr.msk.f32.gmra.mrb[12].mxu1 %vm176_vm3, %v173_v58  ;;  %v494_v58 = vld [vmem:[#allocation2 + $0x130] sm:$0xff] }
 0x113   :  { %2326 = vmatprep.mubr.msk.f32.mxu1 %vm3529_vm0, %v4287_v1  ;;  %3017 = vmatpush3.bf16.msra.mxu1 %v3718_v59 }
 0x114   :  { %3018 = vmatprep.subr.bf16.mxu1 %v4301_v0 }
 0x116   :  { %2327 = vmatmul.mubr.msk.f32.gmra.mrb[14].mxu1 %vm176_vm3, %v174_v60  ;;  %v495_v60 = vld [vmem:[#allocation2 + $0x138] sm:$0xff] }
 0x117   :  { %2329 = vmatprep.mubr.msk.f32.mxu1 %vm3529_vm0, %v4287_v1  ;;  %3020 = vmatpush3.bf16.msra.mxu1 %v3735_v2  ;;  %v3797_v61 = vpack.c.bf16 %v495_v60, %v494_v58  ;;  %v1025_v58 = vld [vmem:[#allocation2 + $0x448] sm:$0xff] }
 0x118   :  { %3021 = vmatprep.subr.bf16.mxu1 %v4301_v0  ;;  %v3839_v60 = vpack.c.bf16 %v1025_v58, %v1024_v56  ;;  %v587_v56 = vld [vmem:[#allocation2 + $0x1d8] sm:$0xff] }
 0x11a   :  { %2330 = vmatmul.mubr.msk.f32.gmra.mrb[16].mxu1 %vm176_vm3, %v175_v63  ;;  %v497_v63 = vld [vmem:[#allocation2 + $0x148] sm:$0xff]  ;;  %4310 = vst [vmem:[#allocation13_spill] sm:$0xff] %v3839_v60 }
 0x11b   :  { %2364 = vmatprep.mubr.msk.f32.mxu1 %vm3529_vm0, %v4287_v1  ;;  %v3801_v3 = vpack.c.bf16 %v497_v63, %v496_v62  ;;  %v580_v63 = vld [vmem:[#allocation2 + $0x1a0] sm:$0xff] }
 0x1cd   :  { %v270_v5 = vpop.f32.mrb[0].mxu1 }
 0x1ce   :  { %v2307_v6 = vpop.f32.mrb[1].mxu1 }
 0x1cf   :  { %v1016_v6 = vld [vmem:[#allocation2 + $0x400] sm:$0xff] }
 0x1d0   :  { %v3804_v9 = vpack.c.bf16 %v1017_v8, %v1016_v6  ;;  %v1027_v6 = vld [vmem:[#allocation2 + $0x458] sm:$0xff] }
 0x1d1   :  { %v275_v10 = vpop.f32.mrb[2].mxu1 }
 0x1d2   :  { %v2310_v11 = vpop.f32.mrb[3].mxu1  ;;  %2365 = vmatmul.mubr.f32.vlgmr.msra.gmra.mrb[18].mxu1 %v275_v10  ;;  %4306 = vst [vmem:[#allocation9_spill] sm:$0xff] %v3804_v9  ;;  %3191 = vmatpush3.bf16.msra.mxu0 %v3804_v9 }
 0x1d3   :  { %3023 = vmatpush3.bf16.msra.mxu1 %v3742_v7  ;;  %2399 = vmatprep.mubr.msk.f32.mxu1 %vm3529_vm0, %v4287_v1  ;;  %v500_v11 = vld [vmem:[#allocation2 + $0x160] sm:$0xff] }
 0x1d4   :  { %3024 = vmatprep.subr.bf16.mxu1 %v4301_v0  ;;  %3192 = vmatprep.subr.bf16.mxu0 %v4301_v0  ;;  %v3815_v20 = vpack.c.bf16 %v501_v13, %v500_v11  ;;  %v582_v11 = vld [vmem:[#allocation2 + $0x1b0] sm:$0xff]  ;;  %v583_v13 = vld [vmem:[#allocation2 + $0x1b8] sm:$0xff] }
 0x1d5   :  { %v3750_v15 = vpop.f32.mrb[4].mxu1 }
 0x1d6   :  { %v2313_v16 = vpop.f32.mrb[5].mxu1 }
 0x1d7   :  { %3026 = vmatpush3.bf16.msra.mxu1 %v3745_v12  ;;  %v1019_v16 = vld [vmem:[#allocation2 + $0x418] sm:$0xff] }
 0x1d8   :  { %3027 = vmatprep.subr.bf16.mxu1 %v4301_v0  ;;  %v3812_v19 = vpack.c.bf16 %v1019_v16, %v1018_v14  ;;  %v1028_v14 = vld [vmem:[#allocation2 + $0x460] sm:$0xff]  ;;  %v1029_v16 = vld [vmem:[#allocation2 + $0x468] sm:$0xff] }
 0x1d9   :  { %v3756_v21 = vpop.f32.mrb[6].mxu1 }
 0x1da   :  { %v2316_v22 = vpop.f32.mrb[7].mxu1  ;;  %4307 = vst [vmem:[#allocation10_spill] sm:$0xff] %v3812_v19  ;;  %3194 = vmatpush3.bf16.msra.mxu0 %v3812_v19  ;;  %v935_v19 = vld [vmem:[#allocation2 + $0x3b8] sm:$0xff] }
 0x1db   :  { %3029 = vmatpush3.bf16.msra.mxu1 %v3753_v17  ;;  %v502_v22 = vld [vmem:[#allocation2 + $0x170] sm:$0xff]  ;;  %3195 = vmatprep.subr.bf16.mxu0 %v4301_v0 }
 0x1dc   :  { %3030 = vmatprep.subr.bf16.mxu1 %v4301_v0  ;;  %v3823_v32 = vpack.c.bf16 %v503_v24, %v502_v22  ;;  %v3857_v22 = vpack.c.bf16 %v1029_v16, %v1028_v14  ;;  %v3860_v24 = vpack.c.bf16 %v583_v13, %v582_v11  ;;  %v590_v13 = vld [vmem:[#allocation2 + $0x1f0] sm:$0xff]  ;;  %v591_v14 = vld [vmem:[#allocation2 + $0x1f8] sm:$0xff]  ;;  %v664_v16 = vld [vmem:[#allocation2 + $0x200] sm:$0xff] }
 0x1dd   :  { %v3762_v26 = vpop.f32.mrb[8].mxu1 }
 0x1de   :  { %v2319_v28 = vpop.f32.mrb[9].mxu1  ;;  %4312 = vst [vmem:[#allocation15_spill] sm:$0xff] %v3857_v22 }
 0x1df   :  { %3032 = vmatpush3.bf16.msra.mxu1 %v3759_v23  ;;  %v1021_v28 = vld [vmem:[#allocation2 + $0x428] sm:$0xff] }
 0x1e0   :  { %3033 = vmatprep.subr.bf16.mxu1 %v4301_v0  ;;  %v3820_v31 = vpack.c.bf16 %v1021_v28, %v1020_v25  ;;  %v584_v28 = vld [vmem:[#allocation2 + $0x1c0] sm:$0xff] }
 0x1e1   :  { %v3783_v48 = vpop.f32.mrb[10].mxu1 }
 0x1e2   :  { %v2322_v52 = vpop.f32.mrb[11].mxu1  ;;  %4308 = vst [vmem:[#allocation11_spill] sm:$0xff] %v3820_v31  ;;  %3197 = vmatpush3.bf16.msra.mxu0 %v3820_v31  ;;  %v933_v31 = vld [vmem:[#allocation2 + $0x3a8] sm:$0xff] }
 0x1e3   :  { %3035 = vmatpush3.bf16.msra.mxu1 %v3765_v30  ;;  %3198 = vmatprep.subr.bf16.mxu0 %v4301_v0  ;;  %v579_v52 = vld [vmem:[#allocation2 + $0x198] sm:$0xff] }
 0x1e4   :  { %3036 = vmatprep.subr.bf16.mxu1 %v4301_v0  ;;  %v3842_v62 = vpack.c.bf16 %v579_v52, %v578_v50  ;;  %v3867_v50 = vpack.c.bf16 %v1031_v41, %v1030_v40  ;;  %v3870_v52 = vpack.c.bf16 %v585_v35, %v584_v28  ;;  %v665_v28 = vld [vmem:[#allocation2 + $0x208] sm:$0xff] }
 0x1e5   :  { %v3833_v49 = vpop.f32.mrb[12].mxu1  ;;  %v3896_v35 = vpack.c.bf16 %v665_v28, %v664_v16  ;;  %v669_v41 = vld [vmem:[#allocation2 + $0x228] sm:$0xff]  ;;  %v678_v16 = vld [vmem:[#allocation2 + $0x270] sm:$0xff]  ;;  %v679_v28 = vld [vmem:[#allocation2 + $0x278] sm:$0xff] }
 0x1e6   :  { %3200 = vmatpush3.bf16.msra.mxu0 %v3828_v44  ;;  %v2325_v54 = vpop.f32.mrb[13].mxu1  ;;  %4313 = vst [vmem:[#allocation16_spill] sm:$0xff] %v3867_v50 }
 0x1e7   :  { %3038 = vmatpush3.bf16.msra.mxu1 %v3769_v34  ;;  %3201 = vmatprep.subr.bf16.mxu0 %v4301_v0  ;;  %v586_v54 = vld [vmem:[#allocation2 + $0x1d0] sm:$0xff] }
 0x1e8   :  { %3039 = vmatprep.subr.bf16.mxu1 %v4301_v0 }
 0x1e9   :  { %v3862_v25 = vpop.f32.mrb[14].mxu1 }
 0x1ea   :  { %3203 = vmatpush3.bf16.msra.mxu0 %v3839_v60  ;;  %v2328_v36 = vpop.f32.mrb[15].mxu1 }
 0x1eb   :  { %3041 = vmatpush3.bf16.msra.mxu1 %v3773_v39  ;;  %3204 = vmatprep.subr.bf16.mxu0 %v4301_v0  ;;  %v667_v36 = vld [vmem:[#allocation2 + $0x218] sm:$0xff] }
 0x1ec   :  { %3042 = vmatprep.subr.bf16.mxu1 %v4301_v0 }
 0x1ed   :  { %v310_v58 = vpop.f32.mrb[16].mxu1 }
 0x1ef   :  { %3044 = vmatpush3.bf16.msra.mxu1 %v3777_v42 }
 0x1f0   :  { %3045 = vmatprep.subr.bf16.mxu1 %v4301_v0 }
 0x1f2   :  { %2400 = vmatmul.mubr.f32.vlgmr.msra.gmra.mrb[18].mxu1 %v270_v5  ;;  %v499_v5 = vld [vmem:[#allocation2 + $0x158] sm:$0xff] }
 0x1f3   :  { %3047 = vmatpush3.bf16.msra.mxu1 %v3781_v46  ;;  %2434 = vmatprep.mubr.msk.f32.mxu1 %vm3529_vm0, %v4287_v1  ;;  %v3807_v10 = vpack.c.bf16 %v499_v5, %v498_v4  ;;  %v581_v4 = vld [vmem:[#allocation2 + $0x1a8] sm:$0xff]  ;;  %v1026_v5 = vld [vmem:[#allocation2 + $0x450] sm:$0xff] }
 0x1f4   :  { %3048 = vmatprep.subr.bf16.mxu1 %v4301_v0  ;;  %v3852_v8 = vpack.c.bf16 %v581_v4, %v580_v63  ;;  %v2331_v63 = vpop.f32.mrb[17].mxu1  ;;  %v3876_v4 = vpack.c.bf16 %v587_v56, %v586_v54  ;;  %v671_v54 = vld [vmem:[#allocation2 + $0x238] sm:$0xff] }
 0x1f7   :  { %3050 = vmatpush3.bf16.msra.mxu1 %v3787_v53 }
 0x1f8   :  { %3051 = vmatprep.subr.bf16.mxu1 %v4301_v0 }
 0x1fb   :  { %3053 = vmatpush3.bf16.msra.mxu1 %v3793_v57 }
 0x1fc   :  { %3054 = vmatprep.subr.bf16.mxu1 %v4301_v0 }
 0x1ff   :  { %3056 = vmatpush3.bf16.msra.mxu1 %v3797_v61 }
 0x200   :  { %3057 = vmatprep.subr.bf16.mxu1 %v4301_v0 }
 0x203   :  { %3059 = vmatpush3.bf16.msra.mxu1 %v3801_v3 }
 0x204   :  { %3060 = vmatprep.subr.bf16.mxu1 %v4301_v0 }
 0x207   :  { %3062 = vmatpush3.bf16.msra.mxu1 %v3807_v10 }
 0x208   :  { %3063 = vmatprep.subr.bf16.mxu1 %v4301_v0 }
 0x20b   :  { %3065 = vmatpush3.bf16.msra.mxu1 %v3815_v20 }
 0x20c   :  { %3066 = vmatprep.subr.bf16.mxu1 %v4301_v0 }
 0x20f   :  { %3068 = vmatpush3.bf16.msra.mxu1 %v3823_v32 }
 0x210   :  { %3069 = vmatprep.subr.bf16.mxu1 %v4301_v0 }
 0x212   :  { %2435 = vmatmul.mubr.f32.vlgmr.msra.gmra.mrb[18].mxu1 %v3750_v15  ;;  %v3849_v15 = vpack.c.bf16 %v1027_v6, %v1026_v5  ;;  %v588_v5 = vld [vmem:[#allocation2 + $0x1e0] sm:$0xff]  ;;  %v589_v6 = vld [vmem:[#allocation2 + $0x1e8] sm:$0xff] }
 0x213   :  { %3071 = vmatpush3.bf16.msra.mxu1 %v3831_v45  ;;  %2469 = vmatprep.mubr.msk.f32.mxu1 %vm3529_vm0, %v4287_v1  ;;  %v3884_v11 = vpack.c.bf16 %v589_v6, %v588_v5  ;;  %v675_v5 = vld [vmem:[#allocation2 + $0x258] sm:$0xff] }
 0x214   :  { %3072 = vmatprep.subr.bf16.mxu1 %v4301_v0  ;;  %4311 = vst [vmem:[#allocation14_spill] sm:$0xff] %v3849_v15  ;;  %3206 = vmatpush3.bf16.msra.mxu0 %v3849_v15 }
 0x215   :  { %3207 = vmatprep.subr.bf16.mxu0 %v4301_v0 }
 0x217   :  { %3074 = vmatpush3.bf16.msra.mxu1 %v3842_v62 }
 0x218   :  { %3075 = vmatprep.subr.bf16.mxu1 %v4301_v0  ;;  %3209 = vmatpush3.bf16.msra.mxu0 %v3857_v22 }
 0x219   :  { %3210 = vmatprep.subr.bf16.mxu0 %v4301_v0 }
 0x21b   :  { %3077 = vmatpush3.bf16.msra.mxu1 %v3852_v8 }
 0x21c   :  { %3078 = vmatprep.subr.bf16.mxu1 %v4301_v0  ;;  %3212 = vmatpush3.bf16.msra.mxu0 %v3867_v50  ;;  %v847_v50 = vld [vmem:[#allocation2 + $0x338] sm:$0xff] }
 0x21d   :  { %3237 = vmatprep.subr.bf16.mxu0 %v4301_v0 }
 0x21f   :  { %3080 = vmatpush3.bf16.msra.mxu1 %v3860_v24  ;;  %2645 = vmatmul.mubr.f32.vlgmr.msra.gmra.mrb[6].mxu0 %v310_v58  ;;  %v673_v58 = vld [vmem:[#allocation2 + $0x248] sm:$0xff] }
 0x220   :  { %3081 = vmatprep.subr.bf16.mxu1 %v4301_v0  ;;  %3239 = vmatpush3.bf16.msra.mxu0 %v3742_v7  ;;  %v3890_v7 = vpack.c.bf16 %v591_v14, %v590_v13  ;;  %v677_v13 = vld [vmem:[#allocation2 + $0x268] sm:$0xff] }
 0x221   :  { %3240 = vmatprep.subr.bf16.mxu0 %v4301_v0  ;;  %2743 = vmatprep.mubr.msk.f32.mxu0 %vm3529_vm0, %v4287_v1 }
 0x223   :  { %3083 = vmatpush3.bf16.msra.mxu1 %v3870_v52 }
 0x224   :  { %3084 = vmatprep.subr.bf16.mxu1 %v4301_v0  ;;  %3242 = vmatpush3.bf16.msra.mxu0 %v3745_v12  ;;  %v666_v12 = vld [vmem:[#allocation2 + $0x210] sm:$0xff] }
 0x225   :  { %3243 = vmatprep.subr.bf16.mxu0 %v4301_v0  ;;  %v3903_v40 = vpack.c.bf16 %v667_v36, %v666_v12  ;;  %v752_v12 = vld [vmem:[#allocation2 + $0x280] sm:$0xff]  ;;  %v753_v36 = vld [vmem:[#allocation2 + $0x288] sm:$0xff] }
 0x227   :  { %3086 = vmatpush3.bf16.msra.mxu1 %v3876_v4 }
 0x228   :  { %3087 = vmatprep.subr.bf16.mxu1 %v4301_v0  ;;  %3245 = vmatpush3.bf16.msra.mxu0 %v3753_v17  ;;  %v668_v17 = vld [vmem:[#allocation2 + $0x220] sm:$0xff] }
 0x229   :  { %3246 = vmatprep.subr.bf16.mxu0 %v4301_v0 }
 0x22b   :  { %3089 = vmatpush3.bf16.msra.mxu1 %v3884_v11 }
 0x22c   :  { %3090 = vmatprep.subr.bf16.mxu1 %v4301_v0  ;;  %3248 = vmatpush3.bf16.msra.mxu0 %v3759_v23  ;;  %v3911_v23 = vpack.c.bf16 %v669_v41, %v668_v17  ;;  %v3941_v17 = vpack.c.bf16 %v753_v36, %v752_v12  ;;  %v754_v41 = vld [vmem:[#allocation2 + $0x290] sm:$0xff]  ;;  %v763_v36 = vld [vmem:[#allocation2 + $0x2d8] sm:$0xff] }
 0x22d   :  { %3249 = vmatprep.subr.bf16.mxu0 %v4301_v0  ;;  %v762_v12 = vld [vmem:[#allocation2 + $0x2d0] sm:$0xff] }
 0x22f   :  { %3092 = vmatpush3.bf16.msra.mxu1 %v3890_v7 }
 0x230   :  { %3093 = vmatprep.subr.bf16.mxu1 %v4301_v0  ;;  %3251 = vmatpush3.bf16.msra.mxu0 %v3765_v30  ;;  %v672_v30 = vld [vmem:[#allocation2 + $0x240] sm:$0xff] }
 0x231   :  { %3252 = vmatprep.subr.bf16.mxu0 %v4301_v0  ;;  %v3923_v63 = vpack.c.bf16 %v673_v58, %v672_v30  ;;  %v756_v30 = vld [vmem:[#allocation2 + $0x2a0] sm:$0xff]  ;;  %v757_v58 = vld [vmem:[#allocation2 + $0x2a8] sm:$0xff] }
 0x232   :  { %2470 = vmatmul.mubr.f32.vlgmr.msra.gmra.mrb[18].mxu1 %v3756_v21  ;;  %v670_v21 = vld [vmem:[#allocation2 + $0x230] sm:$0xff] }
 0x233   :  { %3095 = vmatpush3.bf16.msra.mxu1 %v3896_v35  ;;  %2504 = vmatprep.mubr.msk.f32.mxu1 %vm3529_vm0, %v4287_v1  ;;  %v3917_v56 = vpack.c.bf16 %v671_v54, %v670_v21  ;;  %v755_v21 = vld [vmem:[#allocation2 + $0x298] sm:$0xff] }
 0x234   :  { %3096 = vmatprep.subr.bf16.mxu1 %v4301_v0  ;;  %3254 = vmatpush3.bf16.msra.mxu0 %v3769_v34  ;;  %v674_v34 = vld [vmem:[#allocation2 + $0x250] sm:$0xff]  ;;  %v3946_v54 = vpack.c.bf16 %v755_v21, %v754_v41  ;;  %v3964_v41 = vpack.c.bf16 %v763_v36, %v762_v12  ;;  %v764_v21 = vld [vmem:[#allocation2 + $0x2e0] sm:$0xff]  ;;  %v841_v12 = vld [vmem:[#allocation2 + $0x308] sm:$0xff] }
 0x235   :  { %3255 = vmatprep.subr.bf16.mxu0 %v4301_v0  ;;  %v3929_v6 = vpack.c.bf16 %v675_v5, %v674_v34  ;;  %v3952_v34 = vpack.c.bf16 %v757_v58, %v756_v30  ;;  %v758_v5 = vld [vmem:[#allocation2 + $0x2b0] sm:$0xff]  ;;  %v765_v30 = vld [vmem:[#allocation2 + $0x2e8] sm:$0xff] }
 0x236   :  { %v3968_v58 = vpack.c.bf16 %v765_v30, %v764_v21  ;;  %v842_v21 = vld [vmem:[#allocation2 + $0x310] sm:$0xff]  ;;  %v843_v30 = vld [vmem:[#allocation2 + $0x318] sm:$0xff] }
 0x237   :  { %3098 = vmatpush3.bf16.msra.mxu1 %v3903_v40  ;;  %v3981_v33 = vpack.c.bf16 %v843_v30, %v842_v21  ;;  %v848_v21 = vld [vmem:[#allocation2 + $0x340] sm:$0xff]  ;;  %v849_v30 = vld [vmem:[#allocation2 + $0x348] sm:$0xff] }
 0x238   :  { %3099 = vmatprep.subr.bf16.mxu1 %v4301_v0  ;;  %3257 = vmatpush3.bf16.msra.mxu0 %v3773_v39  ;;  %v676_v39 = vld [vmem:[#allocation2 + $0x260] sm:$0xff] }
 0x239   :  { %3258 = vmatprep.subr.bf16.mxu0 %v4301_v0  ;;  %v3933_v14 = vpack.c.bf16 %v677_v13, %v676_v39  ;;  %v759_v39 = vld [vmem:[#allocation2 + $0x2b8] sm:$0xff]  ;;  %v760_v13 = vld [vmem:[#allocation2 + $0x2c0] sm:$0xff] }
 0x23b   :  { %3101 = vmatpush3.bf16.msra.mxu1 %v3911_v23 }
 0x23c   :  { %3102 = vmatprep.subr.bf16.mxu1 %v4301_v0  ;;  %3260 = vmatpush3.bf16.msra.mxu0 %v3777_v42  ;;  %v3937_v42 = vpack.c.bf16 %v679_v28, %v678_v16  ;;  %v761_v16 = vld [vmem:[#allocation2 + $0x2c8] sm:$0xff] }
 0x23d   :  { %3261 = vmatprep.subr.bf16.mxu0 %v4301_v0  ;;  %v3960_v28 = vpack.c.bf16 %v761_v16, %v760_v13  ;;  %v840_v16 = vld [vmem:[#allocation2 + $0x300] sm:$0xff] }
 0x23e   :  { %v3976_v36 = vpack.c.bf16 %v841_v12, %v840_v16  ;;  %v846_v12 = vld [vmem:[#allocation2 + $0x330] sm:$0xff] }
 0x23f   :  { %3104 = vmatpush3.bf16.msra.mxu1 %v3917_v56 }
 0x240   :  { %3105 = vmatprep.subr.bf16.mxu1 %v4301_v0 }
 0x243   :  { %3107 = vmatpush3.bf16.msra.mxu1 %v3923_v63 }
 0x244   :  { %3108 = vmatprep.subr.bf16.mxu1 %v4301_v0 }
 0x247   :  { %3110 = vmatpush3.bf16.msra.mxu1 %v3929_v6 }
 0x248   :  { %3111 = vmatprep.subr.bf16.mxu1 %v4301_v0 }
 0x24b   :  { %3113 = vmatpush3.bf16.msra.mxu1 %v3933_v14 }
 0x24c   :  { %3114 = vmatprep.subr.bf16.mxu1 %v4301_v0 }
 0x24f   :  { %3116 = vmatpush3.bf16.msra.mxu1 %v3937_v42 }
 0x250   :  { %3117 = vmatprep.subr.bf16.mxu1 %v4301_v0 }
 0x252   :  { %2505 = vmatmul.mubr.f32.vlgmr.msra.gmra.mrb[18].mxu1 %v3762_v26  ;;  %v3956_v26 = vpack.c.bf16 %v759_v39, %v758_v5  ;;  %v766_v5 = vld [vmem:[#allocation2 + $0x2f0] sm:$0xff]  ;;  %v767_v39 = vld [vmem:[#allocation2 + $0x2f8] sm:$0xff] }
 0x253   :  { %3119 = vmatpush3.bf16.msra.mxu1 %v3941_v17  ;;  %2539 = vmatprep.mubr.msk.f32.mxu1 %vm3529_vm0, %v4287_v1  ;;  %v3972_v13 = vpack.c.bf16 %v767_v39, %v766_v5  ;;  %v844_v5 = vld [vmem:[#allocation2 + $0x320] sm:$0xff]  ;;  %v845_v39 = vld [vmem:[#allocation2 + $0x328] sm:$0xff] }
 0x254   :  { %3120 = vmatprep.subr.bf16.mxu1 %v4301_v0  ;;  %v3987_v16 = vpack.c.bf16 %v845_v39, %v844_v5  ;;  %v850_v5 = vld [vmem:[#allocation2 + $0x350] sm:$0xff]  ;;  %v851_v39 = vld [vmem:[#allocation2 + $0x358] sm:$0xff] }
 0x255   :  { %v3999_v22 = vpack.c.bf16 %v851_v39, %v850_v5  ;;  %v928_v5 = vld [vmem:[#allocation2 + $0x380] sm:$0xff]  ;;  %v929_v39 = vld [vmem:[#allocation2 + $0x388] sm:$0xff] }
 0x256   :  { %v4011_v60 = vpack.c.bf16 %v929_v39, %v928_v5  ;;  %v934_v39 = vld [vmem:[#allocation2 + $0x3b0] sm:$0xff] }
 0x257   :  { %3122 = vmatpush3.bf16.msra.mxu1 %v3946_v54 }
 0x258   :  { %3123 = vmatprep.subr.bf16.mxu1 %v4301_v0 }
 0x25b   :  { %3125 = vmatpush3.bf16.msra.mxu1 %v3952_v34 }
 0x25c   :  { %3126 = vmatprep.subr.bf16.mxu1 %v4301_v0 }
 0x25f   :  { %3128 = vmatpush3.bf16.msra.mxu1 %v3956_v26 }
 0x260   :  { %3129 = vmatprep.subr.bf16.mxu1 %v4301_v0 }
 0x263   :  { %3131 = vmatpush3.bf16.msra.mxu1 %v3960_v28 }
 0x264   :  { %3132 = vmatprep.subr.bf16.mxu1 %v4301_v0 }
 0x267   :  { %3134 = vmatpush3.bf16.msra.mxu1 %v3964_v41 }
 0x268   :  { %3135 = vmatprep.subr.bf16.mxu1 %v4301_v0 }
 0x26b   :  { %3137 = vmatpush3.bf16.msra.mxu1 %v3968_v58 }
 0x26c   :  { %3138 = vmatprep.subr.bf16.mxu1 %v4301_v0 }
 0x26f   :  { %3140 = vmatpush3.bf16.msra.mxu1 %v3972_v13 }
 0x270   :  { %3141 = vmatprep.subr.bf16.mxu1 %v4301_v0 }
 0x272   :  { %2540 = vmatmul.mubr.f32.vlgmr.msra.gmra.mrb[18].mxu1 %v3783_v48  ;;  %v3991_v48 = vpack.c.bf16 %v847_v50, %v846_v12  ;;  %v852_v50 = vld [vmem:[#allocation2 + $0x360] sm:$0xff]  ;;  %v853_v12 = vld [vmem:[#allocation2 + $0x368] sm:$0xff] }
 0x273   :  { %3143 = vmatpush3.bf16.msra.mxu1 %v3976_v36  ;;  %2574 = vmatprep.mubr.msk.f32.mxu1 %vm3529_vm0, %v4287_v1  ;;  %v3995_v1 = vpack.c.bf16 %v849_v30, %v848_v21  ;;  %v4003_v38 = vpack.c.bf16 %v853_v12, %v852_v50  ;;  %v854_v21 = vld [vmem:[#allocation2 + $0x370] sm:$0xff]  ;;  %v855_v30 = vld [vmem:[#allocation2 + $0x378] sm:$0xff] }
 0x274   :  { %3144 = vmatprep.subr.bf16.mxu1 %v4301_v0  ;;  %v4007_v15 = vpack.c.bf16 %v855_v30, %v854_v21  ;;  %v930_v50 = vld [vmem:[#allocation2 + $0x390] sm:$0xff]  ;;  %v931_v12 = vld [vmem:[#allocation2 + $0x398] sm:$0xff]  ;;  %v4315_v21 = vmov 0.0   ;;  %v932_v30 = vld [vmem:[#allocation2 + $0x3a0] sm:$0xff] }
 0x275   :  { %v4016_v44 = vpack.c.bf16 %v931_v12, %v930_v50  ;;  %v4022_v5 = vpack.c.bf16 %v933_v31, %v932_v30  ;;  %v936_v50 = vld [vmem:[#allocation2 + $0x3c0] sm:$0xff]  ;;  %v937_v12 = vld [vmem:[#allocation2 + $0x3c8] sm:$0xff]  ;;  %v938_v31 = vld [vmem:[#allocation2 + $0x3d0] sm:$0xff] }
 0x276   :  { %v4030_v9 = vpack.c.bf16 %v937_v12, %v936_v50  ;;  %v939_v30 = vld [vmem:[#allocation2 + $0x3d8] sm:$0xff]  ;;  %v942_v50 = vld [vmem:[#allocation2 + $0x3f0] sm:$0xff] }
 0x277   :  { %3146 = vmatpush3.bf16.msra.mxu1 %v3981_v33  ;;  %4314 = vst [vmem:[#allocation17_spill] sm:$0xff] %v4016_v44  ;;  %4316 = vst [vmem:[#allocation18_spill] sm:$0xff] %v4022_v5  ;;  %v943_v12 = vld [vmem:[#allocation2 + $0x3f8] sm:$0xff] }
 0x278   :  { %3147 = vmatprep.subr.bf16.mxu1 %v4301_v0  ;;  %4318 = vst [vmem:[#allocation20_spill] sm:$0xff] %v4030_v9 }
 0x27b   :  { %3149 = vmatpush3.bf16.msra.mxu1 %v3987_v16 }
 0x27c   :  { %3150 = vmatprep.subr.bf16.mxu1 %v4301_v0 }
 0x27f   :  { %3152 = vmatpush3.bf16.msra.mxu1 %v3991_v48 }
 0x280   :  { %3153 = vmatprep.subr.bf16.mxu1 %v4301_v0 }
 0x283   :  { %3155 = vmatpush3.bf16.msra.mxu1 %v3995_v1 }
 0x284   :  { %3156 = vmatprep.subr.bf16.mxu1 %v4301_v0 }
 0x287   :  { %3158 = vmatpush3.bf16.msra.mxu1 %v3999_v22 }
 0x288   :  { %3159 = vmatprep.subr.bf16.mxu1 %v4301_v0 }
 0x28b   :  { %3161 = vmatpush3.bf16.msra.mxu1 %v4003_v38 }
 0x28c   :  { %3162 = vmatprep.subr.bf16.mxu1 %v4301_v0 }
 0x28f   :  { %3164 = vmatpush3.bf16.msra.mxu1 %v4007_v15 }
 0x290   :  { %3165 = vmatprep.subr.bf16.mxu1 %v4301_v0 }
 0x292   :  { %2575 = vmatmul.mubr.f32.vlgmr.msra.gmra.mrb[18].mxu1 %v3833_v49  ;;  %v4026_v49 = vpack.c.bf16 %v935_v19, %v934_v39  ;;  %v940_v19 = vld [vmem:[#allocation2 + $0x3e0] sm:$0xff]  ;;  %v941_v39 = vld [vmem:[#allocation2 + $0x3e8] sm:$0xff] }
 0x293   :  { %3167 = vmatpush3.bf16.msra.mxu1 %v4011_v60  ;;  %2609 = vmatprep.mubr.msk.f32.mxu1 %vm3529_vm0, %v4315_v21 }
 0x294   :  { %3168 = vmatprep.subr.bf16.mxu1 %v4301_v0  ;;  %4317 = vst [vmem:[#allocation19_spill] sm:$0xff] %v4026_v49 }
 0x297   :  { %3170 = vmatpush3.bf16.msra.mxu1 %v4016_v44  ;;  %v4034_v44 = vpack.c.bf16 %v939_v30, %v938_v31 }
 0x298   :  { %3171 = vmatprep.subr.bf16.mxu1 %v4301_v0 }
 0x299   :  { %4319 = vst [vmem:[#allocation21_spill] sm:$0xff] %v4034_v44 }
 0x29b   :  { %3173 = vmatpush3.bf16.msra.mxu1 %v4022_v5  ;;  %v4038_v5 = vpack.c.bf16 %v941_v39, %v940_v19  ;;  %v63_v19 = vpop.permute.xlu0 %62 }
 0x29c   :  { %3174 = vmatprep.subr.bf16.mxu1 %v4301_v0  ;;  %v156_v39 = vadd.f32 %v3650_v27, %v63_v19  ;;  %v1118_v27 = vld [vmem:[%s4281_s5 + $0x18] sm:$0xff] }
 0x29d   :  { %4320 = vst [vmem:[#allocation22_spill] sm:$0xff] %v4038_v5 }
 0x29f   :  { %3176 = vmatpush3.bf16.msra.mxu1 %v4026_v49  ;;  %v4042_v49 = vpack.c.bf16 %v943_v12, %v942_v50 }
 0x2a0   :  { %3177 = vmatprep.subr.bf16.mxu1 %v4301_v0 }
 0x2a1   :  { %4321 = vst [vmem:[#allocation23_spill] sm:$0xff] %v4042_v49 }
 0x2a3   :  { %3179 = vmatpush3.bf16.msra.mxu1 %v4030_v9  ;;  %v4322_v9 = vmov 1.0  }
 0x2a4   :  { %3180 = vmatprep.subr.bf16.mxu1 %v4301_v0 }
 0x2a7   :  { %3182 = vmatpush3.bf16.msra.mxu1 %v4034_v44 }
 0x2a8   :  { %3183 = vmatprep.subr.bf16.mxu1 %v4301_v0 }
 0x2ab   :  { %3185 = vmatpush3.bf16.msra.mxu1 %v4038_v5 }
 0x2ac   :  { %3186 = vmatprep.subr.bf16.mxu1 %v4301_v0 }
 0x2af   :  { %3188 = vmatpush3.bf16.msra.mxu1 %v4042_v49 }
 0x2b0   :  { %2647 = vmatprep.subr.mxu1 %v4315_v21 }
 0x2b2   :  { %2610 = vmatmul.mubr.f32.vlgmr.msra.gmra.mrb[18].mxu1 %v3862_v25  ;;  %v1115_v25 = vld [vmem:[%s4281_s5] sm:$0xff] }
 0x2b3   :  { %2649 = vmatprep.mubr.msk.f32.mxu1 %vm3529_vm0, %v4315_v21 }
 0x2f2   :  { %v1098_v31 = vpop.f32.mrb[6].mxu0 }
 0x2f3   :  { %v2646_v30 = vpop.f32.mrb[7].mxu0 }
 0x2f4   :  { %v4323_v30 = vmov 0.0|0.0  }
 0x385   :  { %v1010_v44 = vpop.f32.mrb[18].mxu1 }
 0x386   :  { %v3430_v5 = vadd.f32 %v1010_v44, %v156_v39  ;;  %v2611_v50 = vpop.f32.mrb[19].mxu1 }
 0x388   :  { %v3431_v12 = vadd.f32 %v3430_v5, %v1098_v31 }
 0x38a   :  { %v3432_v0 = vadd.f32 %v3431_v12, %v3648_v18  ;;  %v1116_v18 = vld [vmem:[%s4281_s5 + $0x8] sm:$0xff] }
 0x38c   :  { %1907 = vst [vmem:[#allocation5 + $0x8] sm:$0xff] %v3432_v0  ;;  %v1112_v49 = vmul.f32 0.5, %v3432_v0  ;;  %v1117_v0 = vld [vmem:[%s4281_s5 + $0x10] sm:$0xff] }
 0x38e   :  { %vm1113_vm5 = vcmp.ge.f32.partialorder %v1112_v49, 1.0 }
 0x38f   :  { %2648 = vmatpush3.msk.msra.mxu1 %vm1113_vm5, %v4322_v9 }
 0x390   :  { %2650 = vmatmul.mubr.msk.f32.vlgmr.msra.gmra.mrb[20].mxu1 %vm176_vm3, %v1115_v25  ;;  %3213 = vmatprep.subr.bf16.mxu1 %v4323_v30 }
 0x391   :  { %2652 = vmatprep.mubr.msk.f32.mxu1 %vm3529_vm0, %v4315_v21  ;;  %3215 = vmatpush3.bf16.msra.mxu1 %v3655_v29  ;;  %v1119_v29 = vld [vmem:[%s4281_s5 + $0x20] sm:$0xff] }
 0x392   :  { %3216 = vmatprep.subr.bf16.mxu1 %v4323_v30 }
 0x394   :  { %2653 = vmatmul.mubr.msk.f32.gmra.mrb[22].mxu1 %vm176_vm3, %v1116_v18 }
 0x395   :  { %2655 = vmatprep.mubr.msk.f32.mxu1 %vm3529_vm0, %v4315_v21  ;;  %3218 = vmatpush3.bf16.msra.mxu1 %v3666_v37  ;;  %v1120_v37 = vld [vmem:[%s4281_s5 + $0x28] sm:$0xff] }
 0x396   :  { %3219 = vmatprep.subr.bf16.mxu1 %v4323_v30 }
 0x398   :  { %2656 = vmatmul.mubr.msk.f32.gmra.mrb[24].mxu1 %vm176_vm3, %v1117_v0 }
 0x399   :  { %2658 = vmatprep.mubr.msk.f32.mxu1 %vm3529_vm0, %v4315_v21  ;;  %3221 = vmatpush3.bf16.msra.mxu1 %v3678_v43  ;;  %v1121_v43 = vld [vmem:[%s4281_s5 + $0x30] sm:$0xff] }
 0x39a   :  { %3222 = vmatprep.subr.bf16.mxu1 %v4323_v30 }
 0x39c   :  { %2659 = vmatmul.mubr.msk.f32.gmra.mrb[26].mxu1 %vm176_vm3, %v1118_v27 }
 0x39d   :  { %2661 = vmatprep.mubr.msk.f32.mxu1 %vm3529_vm0, %v4315_v21  ;;  %3224 = vmatpush3.bf16.msra.mxu1 %v3688_v47  ;;  %v1122_v47 = vld [vmem:[%s4281_s5 + $0x38] sm:$0xff] }
 0x39e   :  { %3225 = vmatprep.subr.bf16.mxu1 %v4323_v30 }
 0x3a0   :  { %2662 = vmatmul.mubr.msk.f32.gmra.mrb[28].mxu1 %vm176_vm3, %v1119_v29 }
 0x3a1   :  { %2664 = vmatprep.mubr.msk.f32.mxu1 %vm3529_vm0, %v4315_v21  ;;  %3227 = vmatpush3.bf16.msra.mxu1 %v3698_v51  ;;  %v1123_v51 = vld [vmem:[%s4281_s5 + $0x40] sm:$0xff]  ;;  %s3533_s5 = smov [#allocation5]  }
 0x3a2   :  { %3228 = vmatprep.subr.bf16.mxu1 %v4323_v30  ;;  %s1914_s27 = sshll.u32 %s3533_s5, 4  ;;  %s1915_s27 = int_to_ptr.vmem [resolvable:$true] %s1914_s27 }
 0x3a3   :  { %s3499_s28 = scalar_lea.vmem %s1915_s27, 384  ;;  %p3504_p9 = scmp.lt.s32.totalorder %s1915_s27, %s1915_s27 }
 0x3a4   :  { %2665 = vmatmul.mubr.msk.f32.gmra.mrb[30].mxu1 %vm176_vm3, %v1120_v37  ;;  %p3500_p8 = scmp.ne.s32.totalorder %s1915_s27, %s3499_s28  ;;  %p3505_p10 = scmp.lt.s32.totalorder %s3499_s28, %s3499_s28 }
 0x3a5   :  { %2667 = vmatprep.mubr.msk.f32.mxu1 %vm3529_vm0, %v4315_v21  ;;  %3230 = vmatpush3.bf16.msra.mxu1 %v3708_v55 }
 0x3a6   :  { %3231 = vmatprep.subr.bf16.mxu1 %v4323_v30  ;;  %p3506_p11 = por %p3505_p10, %p3504_p9 }
 0x3a8   :  { %2668 = vmatmul.mubr.msk.f32.gmra.mrb[32].mxu1 %vm176_vm3, %v1121_v43  ;;  %p3507_p12 = pnand %p3506_p11, %p3500_p8 }
 0x3a9   :  { %2670 = vmatprep.mubr.msk.f32.mxu1 %vm3529_vm0, %v4315_v21  ;;  %3233 = vmatpush3.bf16.msra.mxu1 %v3718_v59 }
 0x3aa   :  { %3234 = vmatprep.subr.bf16.mxu1 %v4323_v30 }
 0x3ac   :  { %2671 = vmatmul.mubr.msk.f32.gmra.mrb[34].mxu1 %vm176_vm3, %v1122_v47 }
 0x3ad   :  { %2673 = vmatprep.mubr.msk.f32.mxu1 %vm3529_vm0, %v4315_v21  ;;  %3236 = vmatpush3.bf16.msra.mxu1 %v3735_v2 }
 0x3b0   :  { %2674 = vmatmul.mubr.msk.f32.gmra.mrb[36].mxu1 %vm176_vm3, %v1123_v51 }
 0x3b1   :  { %2708 = vmatprep.mubr.msk.f32.mxu1 %vm3529_vm0, %v4315_v21 }
 0x463   :  { %v1217_v55 = vpop.f32.mrb[20].mxu1 }
 0x464   :  { %2744 = vmatmul.mubr.f32.vlgmr.msra.gmra.mrb[8].mxu0 %v1217_v55  ;;  %v2651_v59 = vpop.f32.mrb[21].mxu1 }
 0x465   :  { %3263 = vmatpush3.bf16.msra.mxu0 %v3781_v46  ;;  %2778 = vmatprep.mubr.msk.f32.mxu0 %vm3529_vm0, %v4315_v21 }
 0x466   :  { %3264 = vmatprep.subr.bf16.mxu0 %v4323_v30 }
 0x467   :  { %v1222_v2 = vpop.f32.mrb[22].mxu1 }
 0x468   :  { %2709 = vmatmul.mubr.f32.vlgmr.msra.gmra.mrb[38].mxu1 %v1222_v2  ;;  %v2654_v9 = vpop.f32.mrb[23].mxu1 }
 0x469   :  { %3266 = vmatpush3.bf16.msra.mxu0 %v3787_v53 }
 0x46a   :  { %3267 = vmatprep.subr.bf16.mxu0 %v4323_v30 }
 0x46b   :  { %v1227_v44 = vpop.f32.mrb[24].mxu1 }
 0x46c   :  { %v2657_v5 = vpop.f32.mrb[25].mxu1 }
 0x46d   :  { %3269 = vmatpush3.bf16.msra.mxu0 %v3793_v57 }
 0x46e   :  { %3270 = vmatprep.subr.bf16.mxu0 %v4323_v30 }
 0x46f   :  { %v1232_v49 = vpop.f32.mrb[26].mxu1 }
 0x470   :  { %v2660_v46 = vpop.f32.mrb[27].mxu1 }
 0x471   :  { %3272 = vmatpush3.bf16.msra.mxu0 %v3797_v61 }
 0x472   :  { %3273 = vmatprep.subr.bf16.mxu0 %v4323_v30 }
 0x473   :  { %v1237_v31 = vpop.f32.mrb[28].mxu1 }
 0x474   :  { %v2663_v19 = vpop.f32.mrb[29].mxu1 }
 0x475   :  { %3275 = vmatpush3.bf16.msra.mxu0 %v3801_v3 }
 0x476   :  { %3276 = vmatprep.subr.bf16.mxu0 %v4323_v30 }
 0x477   :  { %v4135_v53 = vpop.f32.mrb[30].mxu1 }
 0x478   :  { %v2666_v39 = vpop.f32.mrb[31].mxu1 }
 0x479   :  { %3278 = vmatpush3.bf16.msra.mxu0 %v3807_v10 }
 0x47a   :  { %3279 = vmatprep.subr.bf16.mxu0 %v4323_v30 }
 0x47b   :  { %v4142_v57 = vpop.f32.mrb[32].mxu1 }
 0x47c   :  { %v2669_v61 = vpop.f32.mrb[33].mxu1 }
 0x47d   :  { %3281 = vmatpush3.bf16.msra.mxu0 %v3815_v20 }
 0x47e   :  { %3282 = vmatprep.subr.bf16.mxu0 %v4323_v30 }
 0x47f   :  { %v4162_v3 = vpop.f32.mrb[34].mxu1 }
 0x480   :  { %v2672_v10 = vpop.f32.mrb[35].mxu1 }
 0x481   :  { %3284 = vmatpush3.bf16.msra.mxu0 %v3823_v32 }
 0x482   :  { %3285 = vmatprep.subr.bf16.mxu0 %v4323_v30 }
 0x483   :  { %v4178_v20 = vpop.f32.mrb[36].mxu1 }
 0x484   :  { %2779 = vmatmul.mubr.f32.vlgmr.msra.gmra.mrb[8].mxu0 %v1227_v44  ;;  %v2675_v32 = vpop.f32.mrb[37].mxu1 }
 0x485   :  { %3287 = vmatpush3.bf16.msra.mxu0 %v3831_v45  ;;  %2813 = vmatprep.mubr.msk.f32.mxu0 %vm3529_vm0, %v4315_v21  ;;  %v4327_v45 = vld [vmem:[#allocation20_spill] sm:$0xff] }
 0x486   :  { %3288 = vmatprep.subr.bf16.mxu0 %v4323_v30 }
 0x489   :  { %3290 = vmatpush3.bf16.msra.mxu0 %v3842_v62  ;;  %v4329_v62 = vld [vmem:[#allocation22_spill] sm:$0xff] }
 0x48a   :  { %3291 = vmatprep.subr.bf16.mxu0 %v4323_v30 }
 0x48d   :  { %3293 = vmatpush3.bf16.msra.mxu0 %v3852_v8  ;;  %v4331_v8 = vld [vmem:[#allocation9_spill] sm:$0xff] }
 0x48e   :  { %3294 = vmatprep.subr.bf16.mxu0 %v4323_v30 }
 0x491   :  { %3296 = vmatpush3.bf16.msra.mxu0 %v3860_v24  ;;  %v4333_v24 = vld [vmem:[#allocation11_spill] sm:$0xff] }
 0x492   :  { %3297 = vmatprep.subr.bf16.mxu0 %v4323_v30 }
 0x495   :  { %3299 = vmatpush3.bf16.msra.mxu0 %v3870_v52  ;;  %v4334_v52 = vld [vmem:[#allocation12_spill] sm:$0xff] }
 0x496   :  { %3300 = vmatprep.subr.bf16.mxu0 %v4323_v30 }
 0x499   :  { %3302 = vmatpush3.bf16.msra.mxu0 %v3876_v4  ;;  %v4335_v4 = vld [vmem:[#allocation13_spill] sm:$0xff] }
 0x49a   :  { %3303 = vmatprep.subr.bf16.mxu0 %v4323_v30 }
 0x49d   :  { %3305 = vmatpush3.bf16.msra.mxu0 %v3884_v11  ;;  %v4336_v11 = vld [vmem:[#allocation14_spill] sm:$0xff] }
 0x49e   :  { %3306 = vmatprep.subr.bf16.mxu0 %v4323_v30 }
 0x4a1   :  { %3308 = vmatpush3.bf16.msra.mxu0 %v3890_v7 }
 0x4a2   :  { %3309 = vmatprep.subr.bf16.mxu0 %v4323_v30 }
 0x4a4   :  { %2814 = vmatmul.mubr.f32.vlgmr.msra.gmra.mrb[8].mxu0 %v1232_v49 }
 0x4a5   :  { %3311 = vmatpush3.bf16.msra.mxu0 %v3896_v35  ;;  %2848 = vmatprep.mubr.msk.f32.mxu0 %vm3529_vm0, %v4315_v21  ;;  %v4337_v35 = vld [vmem:[#allocation8_spill] sm:$0xff] }
 0x4a6   :  { %3312 = vmatprep.subr.bf16.mxu0 %v4323_v30 }
 0x4a9   :  { %3314 = vmatpush3.bf16.msra.mxu0 %v3903_v40 }
 0x4aa   :  { %3315 = vmatprep.subr.bf16.mxu0 %v4323_v30 }
 0x4ad   :  { %3317 = vmatpush3.bf16.msra.mxu0 %v3911_v23 }
 0x4ae   :  { %3318 = vmatprep.subr.bf16.mxu0 %v4323_v30 }
 0x4b1   :  { %3320 = vmatpush3.bf16.msra.mxu0 %v3917_v56  ;;  %v4338_v56 = vld [vmem:[#allocation15_spill] sm:$0xff] }
 0x4b2   :  { %3321 = vmatprep.subr.bf16.mxu0 %v4323_v30 }
 0x4b5   :  { %3323 = vmatpush3.bf16.msra.mxu0 %v3923_v63  ;;  %v4339_v63 = vld [vmem:[#allocation16_spill] sm:$0xff] }
 0x4b6   :  { %3324 = vmatprep.subr.bf16.mxu0 %v4323_v30 }
 0x4b9   :  { %3326 = vmatpush3.bf16.msra.mxu0 %v3929_v6 }
 0x4ba   :  { %3327 = vmatprep.subr.bf16.mxu0 %v4323_v30 }
 0x4bd   :  { %3329 = vmatpush3.bf16.msra.mxu0 %v3933_v14 }
 0x4be   :  { %3330 = vmatprep.subr.bf16.mxu0 %v4323_v30 }
 0x4c1   :  { %3332 = vmatpush3.bf16.msra.mxu0 %v3937_v42 }
 0x4c2   :  { %3333 = vmatprep.subr.bf16.mxu0 %v4323_v30 }
 0x4c4   :  { %2849 = vmatmul.mubr.f32.vlgmr.msra.gmra.mrb[8].mxu0 %v1237_v31 }
 0x4c5   :  { %3335 = vmatpush3.bf16.msra.mxu0 %v3941_v17  ;;  %2883 = vmatprep.mubr.msk.f32.mxu0 %vm3529_vm0, %v4315_v21  ;;  %v1902_v17 = vpop.permute.xlu0 %1901 }
 0x4c6   :  { %3336 = vmatprep.subr.bf16.mxu0 %v4323_v30 }
 0x4c9   :  { %3338 = vmatpush3.bf16.msra.mxu0 %v3946_v54 }
 0x4ca   :  { %3339 = vmatprep.subr.bf16.mxu0 %v4323_v30 }
 0x4cd   :  { %3341 = vmatpush3.bf16.msra.mxu0 %v3952_v34 }
 0x4ce   :  { %3342 = vmatprep.subr.bf16.mxu0 %v4323_v30 }
 0x4d1   :  { %3344 = vmatpush3.bf16.msra.mxu0 %v3956_v26 }
 0x4d2   :  { %3345 = vmatprep.subr.bf16.mxu0 %v4323_v30 }
 0x4d5   :  { %3347 = vmatpush3.bf16.msra.mxu0 %v3960_v28 }
 0x4d6   :  { %3348 = vmatprep.subr.bf16.mxu0 %v4323_v30 }
 0x4d9   :  { %3350 = vmatpush3.bf16.msra.mxu0 %v3964_v41 }
 0x4da   :  { %3351 = vmatprep.subr.bf16.mxu0 %v4323_v30 }
 0x4dd   :  { %3353 = vmatpush3.bf16.msra.mxu0 %v3968_v58 }
 0x4de   :  { %3354 = vmatprep.subr.bf16.mxu0 %v4323_v30 }
 0x4e1   :  { %3356 = vmatpush3.bf16.msra.mxu0 %v3972_v13 }
 0x4e2   :  { %3357 = vmatprep.subr.bf16.mxu0 %v4323_v30 }
 0x4e4   :  { %2884 = vmatmul.mubr.f32.vlgmr.msra.gmra.mrb[8].mxu0 %v4135_v53 }
 0x4e5   :  { %3359 = vmatpush3.bf16.msra.mxu0 %v3976_v36  ;;  %2918 = vmatprep.mubr.msk.f32.mxu0 %vm3529_vm0, %v4315_v21 }
 0x4e6   :  { %3360 = vmatprep.subr.bf16.mxu0 %v4323_v30 }
 0x4e9   :  { %3362 = vmatpush3.bf16.msra.mxu0 %v3981_v33  ;;  %v4325_v33 = vld [vmem:[#allocation18_spill] sm:$0xff] }
 0x4ea   :  { %3363 = vmatprep.subr.bf16.mxu0 %v4323_v30 }
 0x4ed   :  { %3365 = vmatpush3.bf16.msra.mxu0 %v3987_v16 }
 0x4ee   :  { %3366 = vmatprep.subr.bf16.mxu0 %v4323_v30 }
 0x4f1   :  { %3368 = vmatpush3.bf16.msra.mxu0 %v3991_v48 }
 0x4f2   :  { %3369 = vmatprep.subr.bf16.mxu0 %v4323_v30 }
 0x4f5   :  { %3371 = vmatpush3.bf16.msra.mxu0 %v3995_v1  ;;  %v4324_v1 = vld [vmem:[#allocation17_spill] sm:$0xff] }
 0x4f6   :  { %3372 = vmatprep.subr.bf16.mxu0 %v4323_v30 }
 0x4f9   :  { %3374 = vmatpush3.bf16.msra.mxu0 %v3999_v22  ;;  %v4332_v22 = vld [vmem:[#allocation10_spill] sm:$0xff] }
 0x4fa   :  { %3375 = vmatprep.subr.bf16.mxu0 %v4323_v30 }
 0x4fd   :  { %3377 = vmatpush3.bf16.msra.mxu0 %v4003_v38  ;;  %v4326_v38 = vld [vmem:[#allocation19_spill] sm:$0xff] }
 0x4fe   :  { %3378 = vmatprep.subr.bf16.mxu0 %v4323_v30 }
 0x501   :  { %3380 = vmatpush3.bf16.msra.mxu0 %v4007_v15  ;;  %v4330_v15 = vld [vmem:[#allocation23_spill] sm:$0xff] }
 0x502   :  { %3381 = vmatprep.subr.bf16.mxu0 %v4323_v30 }
 0x504   :  { %2919 = vmatmul.mubr.f32.vlgmr.msra.gmra.mrb[8].mxu0 %v4142_v57 }
 0x505   :  { %3383 = vmatpush3.bf16.msra.mxu0 %v4011_v60  ;;  %2953 = vmatprep.mubr.msk.f32.mxu0 %vm3529_vm0, %v4315_v21  ;;  %v4328_v60 = vld [vmem:[#allocation21_spill] sm:$0xff] }
 0x506   :  { %3384 = vmatprep.subr.bf16.mxu0 %v4323_v30 }
 0x509   :  { %3386 = vmatpush3.bf16.msra.mxu0 %v4324_v1 }
 0x50a   :  { %3387 = vmatprep.subr.bf16.mxu0 %v4323_v30 }
 0x50d   :  { %3389 = vmatpush3.bf16.msra.mxu0 %v4325_v33 }
 0x50e   :  { %3390 = vmatprep.subr.bf16.mxu0 %v4323_v30 }
 0x511   :  { %3392 = vmatpush3.bf16.msra.mxu0 %v4326_v38 }
 0x512   :  { %3393 = vmatprep.subr.bf16.mxu0 %v4323_v30 }
 0x515   :  { %3395 = vmatpush3.bf16.msra.mxu0 %v4327_v45 }
 0x516   :  { %3396 = vmatprep.subr.bf16.mxu0 %v4323_v30 }
 0x519   :  { %3398 = vmatpush3.bf16.msra.mxu0 %v4328_v60 }
 0x51a   :  { %3399 = vmatprep.subr.bf16.mxu0 %v4323_v30 }
 0x51d   :  { %3401 = vmatpush3.bf16.msra.mxu0 %v4329_v62 }
 0x51e   :  { %3402 = vmatprep.subr.bf16.mxu0 %v4323_v30 }
 0x521   :  { %3404 = vmatpush3.bf16.msra.mxu0 %v4330_v15 }
 0x522   :  { %3405 = vmatprep.subr.bf16.mxu0 %v4323_v30 }
 0x524   :  { %2954 = vmatmul.mubr.f32.vlgmr.msra.gmra.mrb[8].mxu0 %v4162_v3 }
 0x525   :  { %3407 = vmatpush3.bf16.msra.mxu0 %v4331_v8  ;;  %2988 = vmatprep.mubr.msk.f32.mxu0 %vm3529_vm0, %v4315_v21 }
 0x526   :  { %3408 = vmatprep.subr.bf16.mxu0 %v4323_v30 }
 0x529   :  { %3410 = vmatpush3.bf16.msra.mxu0 %v4332_v22 }
 0x52a   :  { %3411 = vmatprep.subr.bf16.mxu0 %v4323_v30 }
 0x52d   :  { %3413 = vmatpush3.bf16.msra.mxu0 %v4333_v24 }
 0x52e   :  { %3414 = vmatprep.subr.bf16.mxu0 %v4323_v30 }
 0x531   :  { %3416 = vmatpush3.bf16.msra.mxu0 %v4334_v52 }
 0x532   :  { %3417 = vmatprep.subr.bf16.mxu0 %v4323_v30 }
 0x535   :  { %3419 = vmatpush3.bf16.msra.mxu0 %v4335_v4 }
 0x536   :  { %3420 = vmatprep.subr.bf16.mxu0 %v4323_v30 }
 0x539   :  { %3422 = vmatpush3.bf16.msra.mxu0 %v4336_v11 }
 0x53a   :  { %3423 = vmatprep.subr.bf16.mxu0 %v4323_v30 }
 0x53b   :  { %v1327_v7 = vpop.f32.mrb[38].mxu1 }
 0x53c   :  { %v3435_v40 = vadd.f32 %v4337_v35, %v1327_v7  ;;  %v2710_v23 = vpop.f32.mrb[39].mxu1 }
 0x53d   :  { %3425 = vmatpush3.bf16.msra.mxu0 %v4338_v56 }
 0x53e   :  { %3426 = vmatprep.subr.bf16.mxu0 %v4323_v30 }
 0x541   :  { %3428 = vmatpush3.bf16.msra.mxu0 %v4339_v63 }
 0x544   :  { %2989 = vmatmul.mubr.f32.vlgmr.msra.gmra.mrb[8].mxu0 %v4178_v20 }
 0x617   :  { %v1893_v6 = vpop.f32.mrb[8].mxu0 }
 0x618   :  { %v3436_v14 = vadd.f32 %v3435_v40, %v1893_v6  ;;  %v2990_v42 = vpop.f32.mrb[9].mxu0 }
 0x61a   :  { %v3437_v54 = vadd.f32 %v3436_v14, %v1902_v17 }
 0x61c   :  { %1908 = vst [vmem:[#allocation5 + $0x10] sm:$0xff] %v3437_v54 }
 0x61d   :  { %3510 = shalt.err (!%p3507_p12)
}
 0x61e   :  { %s3511_s9 = scalar_lea.hbm %s4284_s8, 384 }
 0x61f   :  { %p3512_p13 = scmp.ne.s32.totalorder %s4284_s8, %s3511_s9  ;;  %p3515_p0 = scmp.lt.u32.totalorder %s3511_s9, %s4284_s8 }
 0x621   :  { %p3517_p1 = pnand %p3515_p0, %p3512_p13 }
 0x623   :  { %3520 = shalt.err (!%p3517_p1)
}
 0x624   :  { %1920 = dma.vmem_to_hbm [thread:$0]  %s1915_s27, 384, %s4284_s8, [#allocation4], %s3526_s15, %s3526_s15, %s3527_s16  }
 0x625   :  { %3523 = dma.done.wait [#allocation4], 384  }
 0x626   :  { %3524 = vsyncadd [#allocation4], 4294966912 }
 0x627   :  { %1924 = vsyncpa [#allocation3], 1 }
 0x628   :  { %1925 = vsyncpa [#allocation4], 1 }

</bundles_post_ra>
